<compile_context>
chip_gen: v7x
topology: tpu7x:2x2x1
jax: 0.10.0
libtpu: 0.0.40
codegen_flags: <defaults>
</compile_context>

<pallas_src>
import functools

import jax
import jax.numpy as jnp
from jax.experimental import pallas as pl
from jax.experimental.pallas import tpu as pltpu

LN_EPS = 1e-5  # torch.nn.LayerNorm default


def _nonlinear_kernel(x_ref, w1_ref, b1_ref, w2_ref, b2_ref, g_ref, beta_ref,
                      o_ref):
    # x: (tm, D) input dtype, w1: (D, F) bf16, b1: (1, F) f32,
    # w2: (F, D) bf16, b2/gamma/beta: (1, D) f32, out: (tm, D)
    x = x_ref[...].astype(jnp.bfloat16)

    # fc1: bf16 MXU matmul, f32 accumulate; bias + ReLU in f32.
    h = jnp.dot(x, w1_ref[...], preferred_element_type=jnp.float32)
    h = jnp.maximum(h + b1_ref[...], 0.0)

    # fc2: re-cast activations to bf16 for the MXU, accumulate in f32.
    y = jnp.dot(h.astype(jnp.bfloat16), w2_ref[...],
                preferred_element_type=jnp.float32) + b2_ref[...]

    # dropout with p=0.0 (module default) is the identity.
    # TODO(synk): stochastic dropout (p>0, training) would need pltpu.prng_*.

    # LayerNorm over the feature axis (biased variance, eps inside rsqrt), f32.
    mean = jnp.mean(y, axis=-1, keepdims=True)
    yc = y - mean
    var = jnp.mean(yc * yc, axis=-1, keepdims=True)
    inv = jax.lax.rsqrt(var + LN_EPS)
    o_ref[...] = (yc * inv * g_ref[...] + beta_ref[...]).astype(o_ref.dtype)


@functools.partial(jax.jit, static_argnames=("tm",))
def nonlinear_forward(x, w1, b1, w2, b2, gamma, beta, *, tm=256):
    """x: (B, S, D) -> (B, S, D).  w1: (D, F), w2: (F, D)."""
    B, S, D = x.shape
    F = w1.shape[1]
    M = B * S

    # Pad the row count up to a multiple of the tile; padded rows are ignored.
    n_tiles = (M + tm - 1) // tm
    Mp = n_tiles * tm
    x2d = x.reshape(M, D)
    if Mp != M:
        x2d = jnp.pad(x2d, ((0, Mp - M), (0, 0)))

    # bf16 weights for the MXU; small vectors stay f32 (post-matmul math is f32).
    w1_bf = w1.astype(jnp.bfloat16)
    w2_bf = w2.astype(jnp.bfloat16)
    b1_2d = b1.reshape(1, F).astype(jnp.float32)
    b2_2d = b2.reshape(1, D).astype(jnp.float32)
    g_2d = gamma.reshape(1, D).astype(jnp.float32)
    beta_2d = beta.reshape(1, D).astype(jnp.float32)

    # Grid-invariant operands: single-buffered (resident across the row grid).
    def _resident(shape):
        return pl.BlockSpec(shape, lambda i: (0, 0),
                            pipeline_mode=pl.Buffered(1))

    # Explicit scoped-VMEM budget: double-buffered x/out tiles + resident
    # weights + the (tm, F) f32 intermediate, plus headroom.
    xb = x.dtype.itemsize
    vmem_need = (2 * tm * D * xb            # x tiles (double-buffered)
                 + 2 * tm * D * xb          # out tiles (double-buffered)
                 + tm * F * 4 + tm * D * 4  # h, y intermediates (f32)
                 + D * F * 2 + F * D * 2    # bf16 weights (single-buffered)
                 + (F + 3 * D) * 4)         # b1, b2, gamma, beta
    vmem_limit = int(min(max(vmem_need + (8 << 20), 32 << 20), 56 << 20))

    cost = pl.CostEstimate(
        flops=2 * Mp * D * F + 2 * Mp * F * D + 10 * Mp * D,
        transcendentals=Mp,  # one rsqrt per row
        bytes_accessed=Mp * D * xb * 2 + (D * F + F * D) * 2 + (F + 3 * D) * 4,
    )

    out2d = pl.pallas_call(
        _nonlinear_kernel,
        out_shape=jax.ShapeDtypeStruct((Mp, D), x.dtype),
        grid_spec=pltpu.PrefetchScalarGridSpec(
            num_scalar_prefetch=0,
            grid=(n_tiles,),
            in_specs=[
                pl.BlockSpec((tm, D), lambda i: (i, 0)),  # x rows (pipelined)
                _resident((D, F)),                        # w1 (bf16, resident)
                _resident((1, F)),                        # b1
                _resident((F, D)),                        # w2 (bf16, resident)
                _resident((1, D)),                        # b2
                _resident((1, D)),                        # gamma
                _resident((1, D)),                        # beta
            ],
            out_specs=pl.BlockSpec((tm, D), lambda i: (i, 0)),
        ),
        compiler_params=pltpu.CompilerParams(
            dimension_semantics=("parallel",),
            vmem_limit_bytes=vmem_limit),
        cost_estimate=cost,
    )(x2d, w1_bf, b1_2d, w2_bf, b2_2d, g_2d, beta_2d)

    return out2d[:M].reshape(B, S, D)


def _reference_bf16(x, w1, b1, w2, b2, gamma, beta):
    """Mirrors the kernel numerics (bf16 MXU inputs, f32 accumulate/LN)."""
    h = jnp.dot(x.astype(jnp.bfloat16), w1.astype(jnp.bfloat16),
                preferred_element_type=jnp.float32)
    h = jnp.maximum(h + b1, 0.0)
    y = jnp.dot(h.astype(jnp.bfloat16), w2.astype(jnp.bfloat16),
                preferred_element_type=jnp.float32) + b2
    mean = jnp.mean(y, axis=-1, keepdims=True)
    var = jnp.mean((y - mean) ** 2, axis=-1, keepdims=True)
    return (y - mean) * jax.lax.rsqrt(var + LN_EPS) * gamma + beta


def _reference_f32(x, w1, b1, w2, b2, gamma, beta):
    """Full-f32 module semantics (torch NonLinear forward)."""
    h = jnp.maximum(x.astype(jnp.float32) @ w1 + b1, 0.0)
    y = h @ w2 + b2
    mean = jnp.mean(y, axis=-1, keepdims=True)
    var = jnp.mean((y - mean) ** 2, axis=-1, keepdims=True)
    return (y - mean) * jax.lax.rsqrt(var + LN_EPS) * gamma + beta


if __name__ == "__main__":
    # NonLinear(in_dim=128) => ffn_dim = 4*128 = 512, out_dim = 128.
    # Lane-dense feature dim (multiple of 128) per the perf review.
    B, S, D = 2, 8, 128
    FF = 4 * D

    key = jax.random.PRNGKey(0)
    kx, k1, k2, k3, k4 = jax.random.split(key, 5)

    x = jax.random.normal(kx, (B, S, D), dtype=jnp.float32)

    # Deterministic parameter init (Kaiming-uniform-ish scale, like nn.Linear).
    lim1 = 1.0 / jnp.sqrt(D)
    w1 = jax.random.uniform(k1, (D, FF), jnp.float32, -lim1, lim1)
    b1 = jax.random.uniform(k2, (FF,), jnp.float32, -lim1, lim1)
    lim2 = 1.0 / jnp.sqrt(FF)
    w2 = jax.random.uniform(k3, (FF, D), jnp.float32, -lim2, lim2)
    b2 = jax.random.uniform(k4, (D,), jnp.float32, -lim2, lim2)
    gamma = jnp.ones((D,), jnp.float32)   # LayerNorm weight init
    beta = jnp.zeros((D,), jnp.float32)   # LayerNorm bias init

    out = nonlinear_forward(x, w1, b1, w2, b2, gamma, beta)
    out = jax.block_until_ready(out)
    assert out.shape == (B, S, D)

    # Tight check against a bf16-mirroring reference (same MXU numerics).
    ref_bf16 = _reference_bf16(x, w1, b1, w2, b2, gamma, beta)
    assert jnp.allclose(out, ref_bf16, atol=1e-3, rtol=1e-3), \
        "mismatch vs bf16-mirroring reference"

    # Looser check against the full-f32 module semantics (bf16 matmul inputs).
    ref_f32 = _reference_f32(x, w1, b1, w2, b2, gamma, beta)
    assert jnp.allclose(out, ref_f32, atol=5e-2, rtol=5e-2), \
        "mismatch vs f32 reference"

    print("KERNEL_OK")
</pallas_src>

<mosaic_0001>
module attributes {stable_mosaic.version = 11 : i64} {
  func.func @_nonlinear_kernel(%arg0: i32, %arg1: memref<256x128xf32, #tpu.memory_space<vmem>>, %arg2: memref<128x512xbf16, #tpu.memory_space<vmem>>, %arg3: memref<1x512xf32, #tpu.memory_space<vmem>>, %arg4: memref<512x128xbf16, #tpu.memory_space<vmem>>, %arg5: memref<1x128xf32, #tpu.memory_space<vmem>>, %arg6: memref<1x128xf32, #tpu.memory_space<vmem>>, %arg7: memref<1x128xf32, #tpu.memory_space<vmem>>, %arg8: memref<256x128xf32, #tpu.memory_space<vmem>>) attributes {dimension_semantics = [#tpu.dimension_semantics<parallel>], iteration_bounds = array<i64: 1>, scalar_prefetch = 0 : i64, scratch_operands = 0 : i64, tpu.core_type = #tpu.core_type<tc>, window_params = [{transform_indices = @transform_0, window_bounds = array<i64: 256, 128>}, {pipeline_mode = #tpu.pipeline_mode<synchronous>, transform_indices = @transform_1, window_bounds = array<i64: 128, 512>}, {pipeline_mode = #tpu.pipeline_mode<synchronous>, transform_indices = @transform_2, window_bounds = array<i64: 1, 512>}, {pipeline_mode = #tpu.pipeline_mode<synchronous>, transform_indices = @transform_3, window_bounds = array<i64: 512, 128>}, {pipeline_mode = #tpu.pipeline_mode<synchronous>, transform_indices = @transform_4, window_bounds = array<i64: 1, 128>}, {pipeline_mode = #tpu.pipeline_mode<synchronous>, transform_indices = @transform_5, window_bounds = array<i64: 1, 128>}, {pipeline_mode = #tpu.pipeline_mode<synchronous>, transform_indices = @transform_6, window_bounds = array<i64: 1, 128>}, {transform_indices = @transform_7, window_bounds = array<i64: 256, 128>}]} {
    %c0 = arith.constant 0 : index
    %c0_0 = arith.constant 0 : index
    %0 = vector.load %arg1[%c0, %c0_0] : memref<256x128xf32, #tpu.memory_space<vmem>>, vector<256x128xf32>
    %1 = arith.truncf %0 : vector<256x128xf32> to vector<256x128xbf16>
    %c0_1 = arith.constant 0 : index
    %c0_2 = arith.constant 0 : index
    %2 = vector.load %arg2[%c0_1, %c0_2] : memref<128x512xbf16, #tpu.memory_space<vmem>>, vector<128x512xbf16>
    %cst = arith.constant dense<0.000000e+00> : vector<256x512xf32>
    %3 = tpu.matmul %1, %2, %cst {dimension_numbers = #tpu.dot_dimension_numbers<[1], [0], [0], [1], [0, 0, 1, 1], [], []>} : vector<256x128xbf16>, vector<128x512xbf16>, vector<256x512xf32> -> vector<256x512xf32>
    %c0_3 = arith.constant 0 : index
    %c0_4 = arith.constant 0 : index
    %4 = vector.load %arg3[%c0_3, %c0_4] : memref<1x512xf32, #tpu.memory_space<vmem>>, vector<1x512xf32>
    %5 = vector.broadcast %4 : vector<1x512xf32> to vector<256x512xf32>
    %6 = arith.addf %3, %5 : vector<256x512xf32>
    %cst_5 = arith.constant 0.000000e+00 : f32
    %7 = vector.broadcast %cst_5 : f32 to vector<256x512xf32>
    %8 = arith.maximumf %6, %7 : vector<256x512xf32>
    %9 = arith.truncf %8 : vector<256x512xf32> to vector<256x512xbf16>
    %c0_6 = arith.constant 0 : index
    %c0_7 = arith.constant 0 : index
    %10 = vector.load %arg4[%c0_6, %c0_7] : memref<512x128xbf16, #tpu.memory_space<vmem>>, vector<512x128xbf16>
    %cst_8 = arith.constant dense<0.000000e+00> : vector<256x128xf32>
    %11 = tpu.matmul %9, %10, %cst_8 {dimension_numbers = #tpu.dot_dimension_numbers<[1], [0], [0], [1], [0, 0, 1, 1], [], []>} : vector<256x512xbf16>, vector<512x128xbf16>, vector<256x128xf32> -> vector<256x128xf32>
    %c0_9 = arith.constant 0 : index
    %c0_10 = arith.constant 0 : index
    %12 = vector.load %arg5[%c0_9, %c0_10] : memref<1x128xf32, #tpu.memory_space<vmem>>, vector<1x128xf32>
    %13 = vector.broadcast %12 : vector<1x128xf32> to vector<256x128xf32>
    %14 = arith.addf %11, %13 : vector<256x128xf32>
    %cst_11 = arith.constant dense<0.000000e+00> : vector<256xf32>
    %15 = vector.multi_reduction <add>, %14, %cst_11 [1] : vector<256x128xf32> to vector<256xf32>
    %16 = vector.shape_cast %15 : vector<256xf32> to vector<256x1xf32>
    %cst_12 = arith.constant 1.280000e+02 : f32
    %17 = vector.broadcast %cst_12 : f32 to vector<256x1xf32>
    %18 = arith.divf %16, %17 : vector<256x1xf32>
    %19 = vector.broadcast %18 : vector<256x1xf32> to vector<256x128xf32>
    %20 = arith.subf %14, %19 : vector<256x128xf32>
    %21 = arith.mulf %20, %20 : vector<256x128xf32>
    %cst_13 = arith.constant dense<0.000000e+00> : vector<256xf32>
    %22 = vector.multi_reduction <add>, %21, %cst_13 [1] : vector<256x128xf32> to vector<256xf32>
    %23 = vector.shape_cast %22 : vector<256xf32> to vector<256x1xf32>
    %cst_14 = arith.constant 1.280000e+02 : f32
    %24 = vector.broadcast %cst_14 : f32 to vector<256x1xf32>
    %25 = arith.divf %23, %24 : vector<256x1xf32>
    %cst_15 = arith.constant 9.99999974E-6 : f32
    %26 = vector.broadcast %cst_15 : f32 to vector<256x1xf32>
    %27 = arith.addf %25, %26 : vector<256x1xf32>
    %28 = math.rsqrt %27 : vector<256x1xf32>
    %29 = vector.broadcast %28 : vector<256x1xf32> to vector<256x128xf32>
    %30 = arith.mulf %20, %29 : vector<256x128xf32>
    %c0_16 = arith.constant 0 : index
    %c0_17 = arith.constant 0 : index
    %31 = vector.load %arg6[%c0_16, %c0_17] : memref<1x128xf32, #tpu.memory_space<vmem>>, vector<1x128xf32>
    %32 = vector.broadcast %31 : vector<1x128xf32> to vector<256x128xf32>
    %33 = arith.mulf %30, %32 : vector<256x128xf32>
    %c0_18 = arith.constant 0 : index
    %c0_19 = arith.constant 0 : index
    %34 = vector.load %arg7[%c0_18, %c0_19] : memref<1x128xf32, #tpu.memory_space<vmem>>, vector<1x128xf32>
    %35 = vector.broadcast %34 : vector<1x128xf32> to vector<256x128xf32>
    %36 = arith.addf %33, %35 : vector<256x128xf32>
    %c0_20 = arith.constant 0 : index
    %c0_21 = arith.constant 0 : index
    %37 = vector.load %arg8[%c0_20, %c0_21] : memref<256x128xf32, #tpu.memory_space<vmem>>, vector<256x128xf32>
    tpu.vector_store %arg8[%c0_20, %c0_21], %36 {strides = array<i32>} : memref<256x128xf32, #tpu.memory_space<vmem>>, vector<256x128xf32>,
    return
  }
  func.func @transform_0(%arg0: i32) -> (i32, i32) {
    %c0_i32 = arith.constant 0 : i32
    %c0_i32_0 = arith.constant 0 : i32
    return %arg0, %c0_i32 : i32, i32
  }
  func.func @transform_1(%arg0: i32) -> (i32, i32) {
    %c0_i32 = arith.constant 0 : i32
    %c0_i32_0 = arith.constant 0 : i32
    %c0_i32_1 = arith.constant 0 : i32
    return %c0_i32, %c0_i32_0 : i32, i32
  }
  func.func @transform_2(%arg0: i32) -> (i32, i32) {
    %c0_i32 = arith.constant 0 : i32
    %c0_i32_0 = arith.constant 0 : i32
    %c0_i32_1 = arith.constant 0 : i32
    return %c0_i32, %c0_i32_0 : i32, i32
  }
  func.func @transform_3(%arg0: i32) -> (i32, i32) {
    %c0_i32 = arith.constant 0 : i32
    %c0_i32_0 = arith.constant 0 : i32
    %c0_i32_1 = arith.constant 0 : i32
    return %c0_i32, %c0_i32_0 : i32, i32
  }
  func.func @transform_4(%arg0: i32) -> (i32, i32) {
    %c0_i32 = arith.constant 0 : i32
    %c0_i32_0 = arith.constant 0 : i32
    %c0_i32_1 = arith.constant 0 : i32
    return %c0_i32, %c0_i32_0 : i32, i32
  }
  func.func @transform_5(%arg0: i32) -> (i32, i32) {
    %c0_i32 = arith.constant 0 : i32
    %c0_i32_0 = arith.constant 0 : i32
    %c0_i32_1 = arith.constant 0 : i32
    return %c0_i32, %c0_i32_0 : i32, i32
  }
  func.func @transform_6(%arg0: i32) -> (i32, i32) {
    %c0_i32 = arith.constant 0 : i32
    %c0_i32_0 = arith.constant 0 : i32
    %c0_i32_1 = arith.constant 0 : i32
    return %c0_i32, %c0_i32_0 : i32, i32
  }
  func.func @transform_7(%arg0: i32) -> (i32, i32) {
    %c0_i32 = arith.constant 0 : i32
    %c0_i32_0 = arith.constant 0 : i32
    return %arg0, %c0_i32 : i32, i32
  }
}

</mosaic_0001>

<bundles_post_ra>
// kernel: nonlinear_forward.1
= control target key start
LH: loop header
LB: loop body
LE: loop exit
PB: predicated region body
PF: predicated region fallthrough
CT: control target
= control target key end

     0   :  { %v2355_v1 = vmov 0   ;;  %s3350_s1 = inlined_call_operand.vmem [shape: bf16[128,512], index: 1, kind: input, shape index: {}]   ;;  %s3351_s0 = inlined_call_operand.vmem [shape: f32[256,128], index: 0, kind: input, shape index: {}]   ;;  %s3352_s3 = inlined_call_operand.vmem [shape: bf16[512,128], index: 3, kind: input, shape index: {}]   ;;  %s3353_s2 = inlined_call_operand.vmem [shape: f32[1,512], index: 2, kind: input, shape index: {}]   ;;  %s3354_s4 = inlined_call_operand.vmem [shape: f32[1,128], index: 4, kind: input, shape index: {}]   ;;  %s3355_s5 = inlined_call_operand.vmem [shape: f32[1,128], index: 5, kind: input, shape index: {}]   ;;  %s3356_s6 = inlined_call_operand.vmem [shape: f32[1,128], index: 6, kind: input, shape index: {}]   ;;  %s3357_s7 = inlined_call_operand.vmem [shape: f32[256,128], index: 7, kind: output, shape index: {}]  }
   0x1   :  { %v2211_v0 = vld [vmem:[%s3350_s1 + $0x4] ss:$16 sps:$4 sm:$0xff]   ;;  %321 = vmatprep.mubr.bf16.mxu0 %v2355_v1  ;;  %514 = vmatprep.mubr.bf16.mxu1 %v2355_v1  ;;  %v2213_v2 = vld [vmem:[%s3350_s1 + $0xc] ss:$16 sps:$4 sm:$0xff]   ;;  %v2215_v3 = vld [vmem:[%s3350_s1] ss:$16 sps:$4 sm:$0xff]  }
   0x2   :  { %289 = vmatprep.subr.bf16.mxu0 %v2211_v0  ;;  %v2216_v4 = vld [vmem:[%s3350_s1 + $0x8] ss:$16 sps:$4 sm:$0xff]   ;;  %482 = vmatprep.subr.bf16.mxu1 %v2213_v2  ;;  %v2217_v5 = vld [vmem:[%s3350_s1 + $0x24] ss:$16 sps:$4 sm:$0xff]   ;;  %v2219_v6 = vld [vmem:[%s3350_s1 + $0x2c] ss:$16 sps:$4 sm:$0xff]  }
   0x3   :  { %290 = vmatpush1.bf16.msra.mxu0 %v2215_v3  ;;  %483 = vmatpush1.bf16.msra.mxu1 %v2216_v4  ;;  %v2221_v7 = vld [vmem:[%s3350_s1 + $0x20] ss:$16 sps:$4 sm:$0xff]   ;;  %v2222_v8 = vld [vmem:[%s3350_s1 + $0x28] ss:$16 sps:$4 sm:$0xff]   ;;  %v2223_v9 = vld [vmem:[%s3350_s1 + $0x44] ss:$16 sps:$4 sm:$0xff]  }
   0x4   :  { %291 = vmatprep.subr.bf16.mxu0 %v2217_v5  ;;  %484 = vmatprep.subr.bf16.mxu1 %v2219_v6  ;;  %v2225_v10 = vld [vmem:[%s3350_s1 + $0x4c] ss:$16 sps:$4 sm:$0xff]   ;;  %v2227_v11 = vld [vmem:[%s3350_s1 + $0x40] ss:$16 sps:$4 sm:$0xff]   ;;  %v2228_v12 = vld [vmem:[%s3350_s1 + $0x48] ss:$16 sps:$4 sm:$0xff]  }
   0x5   :  { %v2229_v13 = vld [vmem:[%s3350_s1 + $0x64] ss:$16 sps:$4 sm:$0xff]   ;;  %v2231_v14 = vld [vmem:[%s3350_s1 + $0x6c] ss:$16 sps:$4 sm:$0xff]   ;;  %v2233_v15 = vld [vmem:[%s3350_s1 + $0x60] ss:$16 sps:$4 sm:$0xff]  }
   0x6   :  { %v2234_v16 = vld [vmem:[%s3350_s1 + $0x68] ss:$16 sps:$4 sm:$0xff]   ;;  %v2235_v17 = vld [vmem:[%s3350_s1 + $0x84] ss:$16 sps:$4 sm:$0xff]   ;;  %v2237_v18 = vld [vmem:[%s3350_s1 + $0x8c] ss:$16 sps:$4 sm:$0xff]  }
   0x7   :  { %292 = vmatpush1.bf16.msra.mxu0 %v2221_v7  ;;  %485 = vmatpush1.bf16.msra.mxu1 %v2222_v8  ;;  %v2239_v19 = vld [vmem:[%s3350_s1 + $0x80] ss:$16 sps:$4 sm:$0xff]   ;;  %v2240_v20 = vld [vmem:[%s3350_s1 + $0x88] ss:$16 sps:$4 sm:$0xff]   ;;  %v2241_v21 = vld [vmem:[%s3350_s1 + $0xa4] ss:$16 sps:$4 sm:$0xff]  }
   0x8   :  { %293 = vmatprep.subr.bf16.mxu0 %v2223_v9  ;;  %486 = vmatprep.subr.bf16.mxu1 %v2225_v10  ;;  %v2243_v22 = vld [vmem:[%s3350_s1 + $0xac] ss:$16 sps:$4 sm:$0xff]   ;;  %v2245_v23 = vld [vmem:[%s3350_s1 + $0xa0] ss:$16 sps:$4 sm:$0xff]   ;;  %v2246_v24 = vld [vmem:[%s3350_s1 + $0xa8] ss:$16 sps:$4 sm:$0xff]  }
   0x9   :  { %v2247_v25 = vld [vmem:[%s3350_s1 + $0xc4] ss:$16 sps:$4 sm:$0xff]   ;;  %v2249_v26 = vld [vmem:[%s3350_s1 + $0xcc] ss:$16 sps:$4 sm:$0xff]   ;;  %v2251_v27 = vld [vmem:[%s3350_s1 + $0xc0] ss:$16 sps:$4 sm:$0xff]  }
   0xa   :  { %v2252_v28 = vld [vmem:[%s3350_s1 + $0xc8] ss:$16 sps:$4 sm:$0xff]   ;;  %v2253_v29 = vld [vmem:[%s3350_s1 + $0xe4] ss:$16 sps:$4 sm:$0xff]   ;;  %v2255_v30 = vld [vmem:[%s3350_s1 + $0xec] ss:$16 sps:$4 sm:$0xff]  }
   0xb   :  { %294 = vmatpush1.bf16.msra.mxu0 %v2227_v11  ;;  %487 = vmatpush1.bf16.msra.mxu1 %v2228_v12  ;;  %v2257_v31 = vld [vmem:[%s3350_s1 + $0xe0] ss:$16 sps:$4 sm:$0xff]   ;;  %v2258_v32 = vld [vmem:[%s3350_s1 + $0xe8] ss:$16 sps:$4 sm:$0xff]  }
   0xc   :  { %295 = vmatprep.subr.bf16.mxu0 %v2229_v13  ;;  %488 = vmatprep.subr.bf16.mxu1 %v2231_v14  ;;  %v27_v33 = vld [vmem:[%s3351_s0] sm:$0xff]  ;;  %v28_v34 = vld [vmem:[%s3351_s0 + $0x8] sm:$0xff]  ;;  %v29_v40 = vld [vmem:[%s3351_s0 + $0x10] sm:$0xff] }
   0xd   :  { %v2259_v35 = vld [vmem:[%s3352_s3 + $0x40] sm:$0xff]   ;;  %v59_v36 = vpack.c.bf16 %v28_v34, %v27_v33  ;;  %v2263_v41 = vld [vmem:[%s3352_s3 + $0x48] sm:$0xff]   ;;  %v30_v42 = vld [vmem:[%s3351_s0 + $0x18] sm:$0xff] }
   0xe   :  { %v2260_v37 = vld [vmem:[%s3352_s3] sm:$0xff]   ;;  %v2264_v43 = vld [vmem:[%s3352_s3 + $0x8] sm:$0xff]   ;;  %v60_v45 = vpack.c.bf16 %v30_v42, %v29_v40  ;;  %v2267_v47 = vld [vmem:[%s3352_s3 + $0x50] sm:$0xff]  }
   0xf   :  { %296 = vmatpush1.bf16.msra.mxu0 %v2233_v15  ;;  %489 = vmatpush1.bf16.msra.mxu1 %v2234_v16  ;;  %v2261_v38 = vld [vmem:[%s3352_s3 + $0xc0] sm:$0xff]   ;;  %v2265_v44 = vld [vmem:[%s3352_s3 + $0xc8] sm:$0xff]   ;;  %v2268_v48 = vld [vmem:[%s3352_s3 + $0x10] sm:$0xff]  }
  0x10   :  { %297 = vmatprep.subr.bf16.mxu0 %v2235_v17  ;;  %490 = vmatprep.subr.bf16.mxu1 %v2237_v18  ;;  %v2262_v39 = vld [vmem:[%s3352_s3 + $0x80] sm:$0xff]   ;;  %v2266_v46 = vld [vmem:[%s3352_s3 + $0x88] sm:$0xff]   ;;  %v2269_v51 = vld [vmem:[%s3352_s3 + $0xd0] sm:$0xff]  }
  0x11   :  { %v31_v49 = vld [vmem:[%s3351_s0 + $0x20] sm:$0xff]  ;;  %v32_v50 = vld [vmem:[%s3351_s0 + $0x28] sm:$0xff]  ;;  %v2270_v52 = vld [vmem:[%s3352_s3 + $0x90] sm:$0xff]  }
  0x12   :  { %v2271_v53 = vld [vmem:[%s3352_s3 + $0x58] sm:$0xff]   ;;  %v61_v56 = vpack.c.bf16 %v32_v50, %v31_v49  ;;  %v2275_v58 = vld [vmem:[%s3352_s3 + $0x60] sm:$0xff]   ;;  %v33_v60 = vld [vmem:[%s3351_s0 + $0x30] sm:$0xff]  ;;  %v109_v50 = vlaneseq }
  0x13   :  { %298 = vmatpush1.bf16.msra.mxu0 %v2239_v19  ;;  %491 = vmatpush1.bf16.msra.mxu1 %v2240_v20  ;;  %v2272_v54 = vld [vmem:[%s3352_s3 + $0x18] sm:$0xff]   ;;  %v2276_v59 = vld [vmem:[%s3352_s3 + $0x20] sm:$0xff]   ;;  %v2279_v0 = vld [vmem:[%s3352_s3 + $0x68] sm:$0xff]  }
  0x14   :  { %299 = vmatprep.subr.bf16.mxu0 %v2241_v21  ;;  %492 = vmatprep.subr.bf16.mxu1 %v2243_v22  ;;  %v2273_v55 = vld [vmem:[%s3352_s3 + $0xd8] sm:$0xff]   ;;  %v2277_v62 = vld [vmem:[%s3352_s3 + $0xe0] sm:$0xff]   ;;  %v2280_v2 = vld [vmem:[%s3352_s3 + $0x28] sm:$0xff]  }
  0x15   :  { %v2274_v57 = vld [vmem:[%s3352_s3 + $0x98] sm:$0xff]   ;;  %v2278_v63 = vld [vmem:[%s3352_s3 + $0xa0] sm:$0xff]   ;;  %v2281_v3 = vld [vmem:[%s3352_s3 + $0xe8] sm:$0xff]  }
  0x16   :  { %v34_v61 = vld [vmem:[%s3351_s0 + $0x38] sm:$0xff]  ;;  %v2282_v5 = vld [vmem:[%s3352_s3 + $0xa8] sm:$0xff]   ;;  %v2283_v6 = vld [vmem:[%s3352_s3 + $0x70] sm:$0xff]  }
  0x17   :  { %300 = vmatpush1.bf16.msra.mxu0 %v2245_v23  ;;  %493 = vmatpush1.bf16.msra.mxu1 %v2246_v24  ;;  %v62_v4 = vpack.c.bf16 %v34_v61, %v33_v60  ;;  %v2284_v7 = vld [vmem:[%s3352_s3 + $0x30] sm:$0xff]   ;;  %v35_v8 = vld [vmem:[%s3351_s0 + $0x40] sm:$0xff]  ;;  %v36_v9 = vld [vmem:[%s3351_s0 + $0x48] sm:$0xff] }
  0x18   :  { %301 = vmatprep.subr.bf16.mxu0 %v2247_v25  ;;  %494 = vmatprep.subr.bf16.mxu1 %v2249_v26  ;;  %v2285_v10 = vld [vmem:[%s3352_s3 + $0xf0] sm:$0xff]   ;;  %v2287_v12 = vld [vmem:[%s3352_s3 + $0x78] sm:$0xff]   ;;  %v63_v15 = vpack.c.bf16 %v36_v9, %v35_v8  ;;  %v39_v20 = vld [vmem:[%s3351_s0 + $0x60] sm:$0xff] }
  0x19   :  { %v2286_v11 = vld [vmem:[%s3352_s3 + $0xb0] sm:$0xff]   ;;  %v2288_v13 = vld [vmem:[%s3352_s3 + $0x38] sm:$0xff]   ;;  %v40_v21 = vld [vmem:[%s3351_s0 + $0x68] sm:$0xff] }
  0x1a   :  { %v2289_v14 = vld [vmem:[%s3352_s3 + $0xf8] sm:$0xff]   ;;  %v37_v17 = vld [vmem:[%s3351_s0 + $0x50] sm:$0xff]  ;;  %v65_v22 = vpack.c.bf16 %v40_v21, %v39_v20  ;;  %v43_v26 = vld [vmem:[%s3351_s0 + $0x80] sm:$0xff] }
  0x1b   :  { %302 = vmatpush1.bf16.msra.mxu0 %v2251_v27  ;;  %495 = vmatpush1.bf16.msra.mxu1 %v2252_v28  ;;  %v2290_v16 = vld [vmem:[%s3352_s3 + $0xb8] sm:$0xff]   ;;  %v41_v23 = vld [vmem:[%s3351_s0 + $0x70] sm:$0xff]  ;;  %v44_v27 = vld [vmem:[%s3351_s0 + $0x88] sm:$0xff] }
  0x1c   :  { %303 = vmatprep.subr.bf16.mxu0 %v2253_v29  ;;  %496 = vmatprep.subr.bf16.mxu1 %v2255_v30  ;;  %v38_v18 = vld [vmem:[%s3351_s0 + $0x58] sm:$0xff]  ;;  %v67_v28 = vpack.c.bf16 %v44_v27, %v43_v26  ;;  %v45_v29 = vld [vmem:[%s3351_s0 + $0x90] sm:$0xff]  ;;  %v48_v33 = vld [vmem:[%s3351_s0 + $0xa8] sm:$0xff] }
  0x1d   :  { %v64_v19 = vpack.c.bf16 %v38_v18, %v37_v17  ;;  %v42_v24 = vld [vmem:[%s3351_s0 + $0x78] sm:$0xff] }
  0x1e   :  { %v66_v25 = vpack.c.bf16 %v42_v24, %v41_v23  ;;  %v46_v30 = vld [vmem:[%s3351_s0 + $0x98] sm:$0xff] }
  0x1f   :  { %304 = vmatpush1.bf16.msra.mxu0 %v2257_v31  ;;  %497 = vmatpush1.bf16.msra.mxu1 %v2258_v32  ;;  %v68_v31 = vpack.c.bf16 %v46_v30, %v45_v29  ;;  %v47_v32 = vld [vmem:[%s3351_s0 + $0xa0] sm:$0xff]  ;;  %v54_v42 = vld [vmem:[%s3351_s0 + $0xd8] sm:$0xff] }
  0x20   :  { %1986 = vmatprep.subr.bf16.mxu0 %v2259_v35  ;;  %2098 = vmatprep.subr.bf16.mxu1 %v2261_v38  ;;  %v69_v34 = vpack.c.bf16 %v48_v33, %v47_v32  ;;  %v49_v35 = vld [vmem:[%s3351_s0 + $0xb0] sm:$0xff]  ;;  %v51_v38 = vld [vmem:[%s3351_s0 + $0xc0] sm:$0xff] }
  0x22   :  { %322 = vmatmul.mubr.bf16.vlgmr.msra.gmra.mrb[0].mxu0 %v59_v36  ;;  %515 = vmatmul.mubr.bf16.vlgmr.msra.gmra.mrb[0].mxu1 %v59_v36  ;;  %v50_v36 = vld [vmem:[%s3351_s0 + $0xb8] sm:$0xff] }
  0x23   :  { %331 = vmatprep.mubr.bf16.mxu0 %v2355_v1  ;;  %524 = vmatprep.mubr.bf16.mxu1 %v2355_v1 }
  0x24   :  { %1987 = vmatpush3.bf16.msra.mxu0 %v2260_v37  ;;  %2099 = vmatpush3.bf16.msra.mxu1 %v2262_v39  ;;  %v70_v37 = vpack.c.bf16 %v50_v36, %v49_v35  ;;  %v52_v39 = vld [vmem:[%s3351_s0 + $0xc8] sm:$0xff] }
  0x25   :  { %1988 = vmatprep.subr.bf16.mxu0 %v2263_v41  ;;  %2100 = vmatprep.subr.bf16.mxu1 %v2265_v44  ;;  %v71_v40 = vpack.c.bf16 %v52_v39, %v51_v38  ;;  %v53_v41 = vld [vmem:[%s3351_s0 + $0xd0] sm:$0xff]  ;;  %v55_v44 = vld [vmem:[%s3351_s0 + $0xe0] sm:$0xff] }
  0x28   :  { %1989 = vmatpush3.bf16.msra.mxu0 %v2264_v43  ;;  %2101 = vmatpush3.bf16.msra.mxu1 %v2266_v46  ;;  %v72_v43 = vpack.c.bf16 %v54_v42, %v53_v41 }
  0x29   :  { %1990 = vmatprep.subr.bf16.mxu0 %v2267_v47  ;;  %2102 = vmatprep.subr.bf16.mxu1 %v2269_v51  ;;  %v57_v47 = vld [vmem:[%s3351_s0 + $0xf0] sm:$0xff]  ;;  %v110_v51 = vshrl.u32 %v109_v50, 7 }
  0x2a   :  { %332 = vmatmul.mubr.bf16.gmra.mrb[4].mxu0 %v60_v45  ;;  %525 = vmatmul.mubr.bf16.gmra.mrb[4].mxu1 %v60_v45  ;;  %v56_v45 = vld [vmem:[%s3351_s0 + $0xe8] sm:$0xff] }
  0x2b   :  { %341 = vmatprep.mubr.bf16.mxu0 %v2355_v1  ;;  %534 = vmatprep.mubr.bf16.mxu1 %v2355_v1  ;;  %v73_v46 = vpack.c.bf16 %v56_v45, %v55_v44 }
  0x2c   :  { %1991 = vmatpush3.bf16.msra.mxu0 %v2268_v48  ;;  %2103 = vmatpush3.bf16.msra.mxu1 %v2270_v52  ;;  %v58_v48 = vld [vmem:[%s3351_s0 + $0xf8] sm:$0xff]  ;;  %v111_v52 = vsub.s32 0, %v110_v51 }
  0x2d   :  { %1992 = vmatprep.subr.bf16.mxu0 %v2271_v53  ;;  %2104 = vmatprep.subr.bf16.mxu1 %v2273_v55  ;;  %v74_v49 = vpack.c.bf16 %v58_v48, %v57_v47  ;;  %v119_v53 = vsub.s32 2, %v110_v51  ;;  %v123_v55 = vsub.s32 3, %v110_v51 }
  0x30   :  { %1993 = vmatpush3.bf16.msra.mxu0 %v2272_v54  ;;  %2105 = vmatpush3.bf16.msra.mxu1 %v2274_v57  ;;  %v107_v54 = vld [vmem:[%s3353_s2] sm:$0xf] }
  0x31   :  { %1994 = vmatprep.subr.bf16.mxu0 %v2275_v58  ;;  %2106 = vmatprep.subr.bf16.mxu1 %v2277_v62  ;;  %v2721_v57 = vrot.slane %v107_v54, %v119_v53 }
  0x32   :  { %342 = vmatmul.mubr.bf16.gmra.mrb[8].mxu0 %v61_v56  ;;  %535 = vmatmul.mubr.bf16.gmra.mrb[8].mxu1 %v61_v56  ;;  %v2719_v56 = vrot.slane %v107_v54, %v111_v52 }
  0x33   :  { %351 = vmatprep.mubr.bf16.mxu0 %v2355_v1  ;;  %544 = vmatprep.mubr.bf16.mxu1 %v2355_v1 }
  0x34   :  { %1995 = vmatpush3.bf16.msra.mxu0 %v2276_v59  ;;  %2107 = vmatpush3.bf16.msra.mxu1 %v2278_v63  ;;  %v2725_v59 = vrot.slane %v107_v54, %v123_v55 }
  0x35   :  { %1996 = vmatprep.subr.bf16.mxu0 %v2279_v0  ;;  %2108 = vmatprep.subr.bf16.mxu1 %v2281_v3 }
  0x38   :  { %1997 = vmatpush3.bf16.msra.mxu0 %v2280_v2  ;;  %2109 = vmatpush3.bf16.msra.mxu1 %v2282_v5 }
  0x39   :  { %1998 = vmatprep.subr.bf16.mxu0 %v2283_v6  ;;  %2110 = vmatprep.subr.bf16.mxu1 %v2285_v10 }
  0x3a   :  { %352 = vmatmul.mubr.bf16.gmra.mrb[12].mxu0 %v62_v4  ;;  %545 = vmatmul.mubr.bf16.gmra.mrb[12].mxu1 %v62_v4 }
  0x3b   :  { %361 = vmatprep.mubr.bf16.mxu0 %v2355_v1  ;;  %554 = vmatprep.mubr.bf16.mxu1 %v2355_v1 }
  0x3c   :  { %1999 = vmatpush3.bf16.msra.mxu0 %v2284_v7  ;;  %2111 = vmatpush3.bf16.msra.mxu1 %v2286_v11 }
  0x3d   :  { %2000 = vmatprep.subr.bf16.mxu0 %v2287_v12  ;;  %2112 = vmatprep.subr.bf16.mxu1 %v2289_v14 }
  0x40   :  { %2001 = vmatpush3.bf16.msra.mxu0 %v2288_v13  ;;  %2113 = vmatpush3.bf16.msra.mxu1 %v2290_v16 }
  0x42   :  { %362 = vmatmul.mubr.bf16.gmra.mrb[16].mxu0 %v63_v15  ;;  %555 = vmatmul.mubr.bf16.gmra.mrb[16].mxu1 %v63_v15 }
  0x43   :  { %371 = vmatprep.mubr.bf16.mxu0 %v2355_v1  ;;  %564 = vmatprep.mubr.bf16.mxu1 %v2355_v1 }
  0x4a   :  { %372 = vmatmul.mubr.bf16.gmra.mrb[20].mxu0 %v64_v19  ;;  %565 = vmatmul.mubr.bf16.gmra.mrb[20].mxu1 %v64_v19 }
  0x4b   :  { %381 = vmatprep.mubr.bf16.mxu0 %v2355_v1  ;;  %574 = vmatprep.mubr.bf16.mxu1 %v2355_v1 }
  0x52   :  { %382 = vmatmul.mubr.bf16.gmra.mrb[24].mxu0 %v65_v22  ;;  %575 = vmatmul.mubr.bf16.gmra.mrb[24].mxu1 %v65_v22 }
  0x53   :  { %391 = vmatprep.mubr.bf16.mxu0 %v2355_v1  ;;  %584 = vmatprep.mubr.bf16.mxu1 %v2355_v1 }
  0x5a   :  { %392 = vmatmul.mubr.bf16.gmra.mrb[28].mxu0 %v66_v25  ;;  %585 = vmatmul.mubr.bf16.gmra.mrb[28].mxu1 %v66_v25 }
  0x5b   :  { %401 = vmatprep.mubr.bf16.mxu0 %v2355_v1  ;;  %594 = vmatprep.mubr.bf16.mxu1 %v2355_v1 }
  0x62   :  { %402 = vmatmul.mubr.bf16.gmra.mrb[32].mxu0 %v67_v28  ;;  %595 = vmatmul.mubr.bf16.gmra.mrb[32].mxu1 %v67_v28 }
  0x63   :  { %411 = vmatprep.mubr.bf16.mxu0 %v2355_v1  ;;  %604 = vmatprep.mubr.bf16.mxu1 %v2355_v1 }
  0x6a   :  { %412 = vmatmul.mubr.bf16.gmra.mrb[36].mxu0 %v68_v31  ;;  %605 = vmatmul.mubr.bf16.gmra.mrb[36].mxu1 %v68_v31 }
  0x6b   :  { %421 = vmatprep.mubr.bf16.mxu0 %v2355_v1  ;;  %614 = vmatprep.mubr.bf16.mxu1 %v2355_v1 }
  0x72   :  { %422 = vmatmul.mubr.bf16.gmra.mrb[40].mxu0 %v69_v34  ;;  %615 = vmatmul.mubr.bf16.gmra.mrb[40].mxu1 %v69_v34 }
  0x73   :  { %431 = vmatprep.mubr.bf16.mxu0 %v2355_v1  ;;  %624 = vmatprep.mubr.bf16.mxu1 %v2355_v1 }
  0x7a   :  { %432 = vmatmul.mubr.bf16.gmra.mrb[44].mxu0 %v70_v37  ;;  %625 = vmatmul.mubr.bf16.gmra.mrb[44].mxu1 %v70_v37 }
  0x7b   :  { %441 = vmatprep.mubr.bf16.mxu0 %v2355_v1  ;;  %634 = vmatprep.mubr.bf16.mxu1 %v2355_v1 }
  0x82   :  { %442 = vmatmul.mubr.bf16.gmra.mrb[48].mxu0 %v71_v40  ;;  %635 = vmatmul.mubr.bf16.gmra.mrb[48].mxu1 %v71_v40 }
  0x83   :  { %451 = vmatprep.mubr.bf16.mxu0 %v2355_v1  ;;  %644 = vmatprep.mubr.bf16.mxu1 %v2355_v1 }
  0x8a   :  { %452 = vmatmul.mubr.bf16.gmra.mrb[52].mxu0 %v72_v43  ;;  %645 = vmatmul.mubr.bf16.gmra.mrb[52].mxu1 %v72_v43 }
  0x8b   :  { %461 = vmatprep.mubr.bf16.mxu0 %v2355_v1  ;;  %654 = vmatprep.mubr.bf16.mxu1 %v2355_v1 }
  0x92   :  { %462 = vmatmul.mubr.bf16.gmra.mrb[56].mxu0 %v73_v46  ;;  %655 = vmatmul.mubr.bf16.gmra.mrb[56].mxu1 %v73_v46 }
  0x93   :  { %471 = vmatprep.mubr.bf16.mxu0 %v2355_v1  ;;  %664 = vmatprep.mubr.bf16.mxu1 %v2355_v1  ;;  %v115_v1 = vsub.s32 1, %v110_v51 }
  0x95   :  { %v2723_v58 = vrot.slane %v107_v54, %v115_v1 }
  0x9a   :  { %472 = vmatmul.mubr.bf16.gmra.mrb[60].mxu0 %v74_v49  ;;  %665 = vmatmul.mubr.bf16.gmra.mrb[60].mxu1 %v74_v49 }
  0xf5   :  { %v323_v60 = vpop.f32.mrb[0].mxu0  ;;  %v516_v61 = vpop.f32.mrb[0].mxu1 }
  0xf6   :  { %v324_v62 = vadd.f32 %v323_v60, %v2719_v56  ;;  %v517_v63 = vadd.f32 %v516_v61, %v2721_v57  ;;  %v325_v0 = vpop.f32.mrb[1].mxu0  ;;  %v518_v2 = vpop.f32.mrb[1].mxu1 }
  0xf7   :  { %v326_v3 = vadd.f32 %v325_v0, %v2723_v58  ;;  %v519_v4 = vadd.f32 %v518_v2, %v2725_v59  ;;  %v327_v5 = vpop.f32.mrb[2].mxu0  ;;  %v520_v6 = vpop.f32.mrb[2].mxu1 }
  0xf8   :  { %v677_v7 = vmax.f32 %v517_v63, 0.0  ;;  %v328_v8 = vadd.f32 %v327_v5, %v2719_v56  ;;  %v521_v9 = vadd.f32 %v520_v6, %v2721_v57  ;;  %v329_v10 = vpop.f32.mrb[3].mxu0  ;;  %v522_v11 = vpop.f32.mrb[3].mxu1  ;;  %v675_v15 = vmax.f32 %v324_v62, 0.0 }
  0xf9   :  { %v678_v12 = vmax.f32 %v519_v4, 0.0  ;;  %v330_v13 = vadd.f32 %v329_v10, %v2723_v58  ;;  %v523_v14 = vadd.f32 %v522_v11, %v2725_v59  ;;  %v676_v18 = vmax.f32 %v326_v3, 0.0 }
  0xfa   :  { %v679_v16 = vmax.f32 %v328_v8, 0.0  ;;  %v681_v17 = vmax.f32 %v521_v9, 0.0 }
  0xfb   :  { %v680_v19 = vmax.f32 %v330_v13, 0.0  ;;  %v682_v20 = vmax.f32 %v523_v14, 0.0 }
  0xfc   :  { %v803_v21 = vpack.c.bf16 %v679_v16, %v675_v15  ;;  %v805_v22 = vpack.c.bf16 %v681_v17, %v677_v7 }
  0xfd   :  { %v804_v23 = vpack.c.bf16 %v680_v19, %v676_v18  ;;  %v806_v24 = vpack.c.bf16 %v682_v20, %v678_v12  ;;  %v333_v25 = vpop.f32.mrb[4].mxu0  ;;  %v526_v26 = vpop.f32.mrb[4].mxu1 }
  0xfe   :  { %v334_v27 = vadd.f32 %v333_v25, %v2719_v56  ;;  %v527_v28 = vadd.f32 %v526_v26, %v2721_v57  ;;  %v335_v29 = vpop.f32.mrb[5].mxu0  ;;  %v528_v30 = vpop.f32.mrb[5].mxu1 }
  0xff   :  { %v336_v31 = vadd.f32 %v335_v29, %v2723_v58  ;;  %v529_v32 = vadd.f32 %v528_v30, %v2725_v59  ;;  %v337_v33 = vpop.f32.mrb[6].mxu0  ;;  %v530_v34 = vpop.f32.mrb[6].mxu1  ;;  %1162 = vmatprep.mubr.bf16.mxu0 %v804_v23  ;;  %1323 = vmatprep.mubr.bf16.mxu1 %v806_v24 }
 0x100   :  { %v685_v35 = vmax.f32 %v527_v28, 0.0  ;;  %v338_v36 = vadd.f32 %v337_v33, %v2719_v56  ;;  %v531_v37 = vadd.f32 %v530_v34, %v2721_v57  ;;  %v339_v38 = vpop.f32.mrb[7].mxu0  ;;  %v532_v39 = vpop.f32.mrb[7].mxu1  ;;  %1163 = vmatmul.mubr.bf16.vlgmr.msra.gmra.mrb[64].mxu0 %v803_v21  ;;  %1324 = vmatmul.mubr.bf16.vlgmr.msra.gmra.mrb[64].mxu1 %v805_v22  ;;  %v683_v43 = vmax.f32 %v334_v27, 0.0 }
 0x101   :  { %v686_v40 = vmax.f32 %v529_v32, 0.0  ;;  %v340_v41 = vadd.f32 %v339_v38, %v2723_v58  ;;  %v533_v42 = vadd.f32 %v532_v39, %v2725_v59  ;;  %v684_v46 = vmax.f32 %v336_v31, 0.0 }
 0x102   :  { %v687_v44 = vmax.f32 %v338_v36, 0.0  ;;  %v689_v45 = vmax.f32 %v531_v37, 0.0 }
 0x103   :  { %v688_v47 = vmax.f32 %v340_v41, 0.0  ;;  %v690_v48 = vmax.f32 %v533_v42, 0.0 }
 0x104   :  { %v807_v49 = vpack.c.bf16 %v687_v44, %v683_v43  ;;  %v809_v50 = vpack.c.bf16 %v689_v45, %v685_v35 }
 0x105   :  { %v808_v51 = vpack.c.bf16 %v688_v47, %v684_v46  ;;  %v810_v52 = vpack.c.bf16 %v690_v48, %v686_v40  ;;  %v343_v53 = vpop.f32.mrb[8].mxu0  ;;  %v536_v54 = vpop.f32.mrb[8].mxu1 }
 0x106   :  { %v344_v1 = vadd.f32 %v343_v53, %v2719_v56  ;;  %v537_v55 = vadd.f32 %v536_v54, %v2721_v57  ;;  %v345_v60 = vpop.f32.mrb[9].mxu0  ;;  %v538_v61 = vpop.f32.mrb[9].mxu1 }
 0x107   :  { %v346_v62 = vadd.f32 %v345_v60, %v2723_v58  ;;  %v539_v63 = vadd.f32 %v538_v61, %v2725_v59  ;;  %v347_v0 = vpop.f32.mrb[10].mxu0  ;;  %v540_v2 = vpop.f32.mrb[10].mxu1  ;;  %1170 = vmatprep.mubr.bf16.mxu0 %v808_v51  ;;  %1331 = vmatprep.mubr.bf16.mxu1 %v810_v52 }
 0x108   :  { %v693_v3 = vmax.f32 %v537_v55, 0.0  ;;  %v348_v4 = vadd.f32 %v347_v0, %v2719_v56  ;;  %v541_v5 = vadd.f32 %v540_v2, %v2721_v57  ;;  %v349_v6 = vpop.f32.mrb[11].mxu0  ;;  %v542_v7 = vpop.f32.mrb[11].mxu1  ;;  %1171 = vmatmul.mubr.bf16.gmra.mrb[68].mxu0 %v807_v49  ;;  %1332 = vmatmul.mubr.bf16.gmra.mrb[68].mxu1 %v809_v50  ;;  %v691_v11 = vmax.f32 %v344_v1, 0.0 }
 0x109   :  { %v694_v8 = vmax.f32 %v539_v63, 0.0  ;;  %v350_v9 = vadd.f32 %v349_v6, %v2723_v58  ;;  %v543_v10 = vadd.f32 %v542_v7, %v2725_v59  ;;  %v692_v14 = vmax.f32 %v346_v62, 0.0 }
 0x10a   :  { %v695_v12 = vmax.f32 %v348_v4, 0.0  ;;  %v697_v13 = vmax.f32 %v541_v5, 0.0 }
 0x10b   :  { %v696_v15 = vmax.f32 %v350_v9, 0.0  ;;  %v698_v16 = vmax.f32 %v543_v10, 0.0 }
 0x10c   :  { %v811_v17 = vpack.c.bf16 %v695_v12, %v691_v11  ;;  %v813_v18 = vpack.c.bf16 %v697_v13, %v693_v3 }
 0x10d   :  { %v812_v19 = vpack.c.bf16 %v696_v15, %v692_v14  ;;  %v814_v20 = vpack.c.bf16 %v698_v16, %v694_v8  ;;  %v353_v21 = vpop.f32.mrb[12].mxu0  ;;  %v546_v22 = vpop.f32.mrb[12].mxu1 }
 0x10e   :  { %v354_v23 = vadd.f32 %v353_v21, %v2719_v56  ;;  %v547_v24 = vadd.f32 %v546_v22, %v2721_v57  ;;  %v355_v25 = vpop.f32.mrb[13].mxu0  ;;  %v548_v26 = vpop.f32.mrb[13].mxu1 }
 0x10f   :  { %v356_v27 = vadd.f32 %v355_v25, %v2723_v58  ;;  %v549_v28 = vadd.f32 %v548_v26, %v2725_v59  ;;  %v357_v29 = vpop.f32.mrb[14].mxu0  ;;  %v550_v30 = vpop.f32.mrb[14].mxu1  ;;  %1178 = vmatprep.mubr.bf16.mxu0 %v812_v19  ;;  %1339 = vmatprep.mubr.bf16.mxu1 %v814_v20 }
 0x110   :  { %v701_v31 = vmax.f32 %v547_v24, 0.0  ;;  %v358_v32 = vadd.f32 %v357_v29, %v2719_v56  ;;  %v551_v33 = vadd.f32 %v550_v30, %v2721_v57  ;;  %v359_v34 = vpop.f32.mrb[15].mxu0  ;;  %v552_v35 = vpop.f32.mrb[15].mxu1  ;;  %1179 = vmatmul.mubr.bf16.gmra.mrb[72].mxu0 %v811_v17  ;;  %1340 = vmatmul.mubr.bf16.gmra.mrb[72].mxu1 %v813_v18  ;;  %v699_v39 = vmax.f32 %v354_v23, 0.0 }
 0x111   :  { %v702_v36 = vmax.f32 %v549_v28, 0.0  ;;  %v360_v37 = vadd.f32 %v359_v34, %v2723_v58  ;;  %v553_v38 = vadd.f32 %v552_v35, %v2725_v59  ;;  %v700_v42 = vmax.f32 %v356_v27, 0.0 }
 0x112   :  { %v703_v40 = vmax.f32 %v358_v32, 0.0  ;;  %v705_v41 = vmax.f32 %v551_v33, 0.0 }
 0x113   :  { %v704_v43 = vmax.f32 %v360_v37, 0.0  ;;  %v706_v44 = vmax.f32 %v553_v38, 0.0 }
 0x114   :  { %v815_v45 = vpack.c.bf16 %v703_v40, %v699_v39  ;;  %v817_v46 = vpack.c.bf16 %v705_v41, %v701_v31 }
 0x115   :  { %v816_v47 = vpack.c.bf16 %v704_v43, %v700_v42  ;;  %v818_v48 = vpack.c.bf16 %v706_v44, %v702_v36  ;;  %v363_v49 = vpop.f32.mrb[16].mxu0  ;;  %v556_v50 = vpop.f32.mrb[16].mxu1 }
 0x116   :  { %v364_v51 = vadd.f32 %v363_v49, %v2719_v56  ;;  %v557_v52 = vadd.f32 %v556_v50, %v2721_v57  ;;  %v365_v53 = vpop.f32.mrb[17].mxu0  ;;  %v558_v54 = vpop.f32.mrb[17].mxu1 }
 0x117   :  { %v366_v1 = vadd.f32 %v365_v53, %v2723_v58  ;;  %v559_v55 = vadd.f32 %v558_v54, %v2725_v59  ;;  %v367_v60 = vpop.f32.mrb[18].mxu0  ;;  %v560_v61 = vpop.f32.mrb[18].mxu1  ;;  %1186 = vmatprep.mubr.bf16.mxu0 %v816_v47  ;;  %1347 = vmatprep.mubr.bf16.mxu1 %v818_v48 }
 0x118   :  { %v709_v62 = vmax.f32 %v557_v52, 0.0  ;;  %v368_v63 = vadd.f32 %v367_v60, %v2719_v56  ;;  %v561_v0 = vadd.f32 %v560_v61, %v2721_v57  ;;  %v369_v2 = vpop.f32.mrb[19].mxu0  ;;  %v562_v3 = vpop.f32.mrb[19].mxu1  ;;  %1187 = vmatmul.mubr.bf16.gmra.mrb[76].mxu0 %v815_v45  ;;  %1348 = vmatmul.mubr.bf16.gmra.mrb[76].mxu1 %v817_v46  ;;  %v707_v7 = vmax.f32 %v364_v51, 0.0 }
 0x119   :  { %v710_v4 = vmax.f32 %v559_v55, 0.0  ;;  %v370_v5 = vadd.f32 %v369_v2, %v2723_v58  ;;  %v563_v6 = vadd.f32 %v562_v3, %v2725_v59  ;;  %v708_v10 = vmax.f32 %v366_v1, 0.0 }
 0x11a   :  { %v711_v8 = vmax.f32 %v368_v63, 0.0  ;;  %v713_v9 = vmax.f32 %v561_v0, 0.0 }
 0x11b   :  { %v712_v11 = vmax.f32 %v370_v5, 0.0  ;;  %v714_v12 = vmax.f32 %v563_v6, 0.0 }
 0x11c   :  { %v819_v13 = vpack.c.bf16 %v711_v8, %v707_v7  ;;  %v821_v14 = vpack.c.bf16 %v713_v9, %v709_v62 }
 0x11d   :  { %v820_v15 = vpack.c.bf16 %v712_v11, %v708_v10  ;;  %v822_v16 = vpack.c.bf16 %v714_v12, %v710_v4  ;;  %v373_v17 = vpop.f32.mrb[20].mxu0  ;;  %v566_v18 = vpop.f32.mrb[20].mxu1 }
 0x11e   :  { %v374_v19 = vadd.f32 %v373_v17, %v2719_v56  ;;  %v567_v20 = vadd.f32 %v566_v18, %v2721_v57  ;;  %v375_v21 = vpop.f32.mrb[21].mxu0  ;;  %v568_v22 = vpop.f32.mrb[21].mxu1 }
 0x11f   :  { %v376_v23 = vadd.f32 %v375_v21, %v2723_v58  ;;  %v569_v24 = vadd.f32 %v568_v22, %v2725_v59  ;;  %v377_v25 = vpop.f32.mrb[22].mxu0  ;;  %v570_v26 = vpop.f32.mrb[22].mxu1  ;;  %1194 = vmatprep.mubr.bf16.mxu0 %v820_v15  ;;  %1355 = vmatprep.mubr.bf16.mxu1 %v822_v16 }
 0x120   :  { %v717_v27 = vmax.f32 %v567_v20, 0.0  ;;  %v378_v28 = vadd.f32 %v377_v25, %v2719_v56  ;;  %v571_v29 = vadd.f32 %v570_v26, %v2721_v57  ;;  %v379_v30 = vpop.f32.mrb[23].mxu0  ;;  %v572_v31 = vpop.f32.mrb[23].mxu1  ;;  %1195 = vmatmul.mubr.bf16.gmra.mrb[80].mxu0 %v819_v13  ;;  %1356 = vmatmul.mubr.bf16.gmra.mrb[80].mxu1 %v821_v14  ;;  %v715_v35 = vmax.f32 %v374_v19, 0.0 }
 0x121   :  { %v718_v32 = vmax.f32 %v569_v24, 0.0  ;;  %v380_v33 = vadd.f32 %v379_v30, %v2723_v58  ;;  %v573_v34 = vadd.f32 %v572_v31, %v2725_v59  ;;  %v716_v38 = vmax.f32 %v376_v23, 0.0 }
 0x122   :  { %v719_v36 = vmax.f32 %v378_v28, 0.0  ;;  %v721_v37 = vmax.f32 %v571_v29, 0.0 }
 0x123   :  { %v720_v39 = vmax.f32 %v380_v33, 0.0  ;;  %v722_v40 = vmax.f32 %v573_v34, 0.0 }
 0x124   :  { %v823_v41 = vpack.c.bf16 %v719_v36, %v715_v35  ;;  %v825_v42 = vpack.c.bf16 %v721_v37, %v717_v27 }
 0x125   :  { %v824_v43 = vpack.c.bf16 %v720_v39, %v716_v38  ;;  %v826_v44 = vpack.c.bf16 %v722_v40, %v718_v32  ;;  %v383_v45 = vpop.f32.mrb[24].mxu0  ;;  %v576_v46 = vpop.f32.mrb[24].mxu1 }
 0x126   :  { %v384_v47 = vadd.f32 %v383_v45, %v2719_v56  ;;  %v577_v48 = vadd.f32 %v576_v46, %v2721_v57  ;;  %v385_v49 = vpop.f32.mrb[25].mxu0  ;;  %v578_v50 = vpop.f32.mrb[25].mxu1 }
 0x127   :  { %v386_v51 = vadd.f32 %v385_v49, %v2723_v58  ;;  %v579_v52 = vadd.f32 %v578_v50, %v2725_v59  ;;  %v387_v53 = vpop.f32.mrb[26].mxu0  ;;  %v580_v54 = vpop.f32.mrb[26].mxu1  ;;  %1202 = vmatprep.mubr.bf16.mxu0 %v824_v43  ;;  %1363 = vmatprep.mubr.bf16.mxu1 %v826_v44 }
 0x128   :  { %v725_v1 = vmax.f32 %v577_v48, 0.0  ;;  %v388_v55 = vadd.f32 %v387_v53, %v2719_v56  ;;  %v581_v60 = vadd.f32 %v580_v54, %v2721_v57  ;;  %v389_v61 = vpop.f32.mrb[27].mxu0  ;;  %v582_v62 = vpop.f32.mrb[27].mxu1  ;;  %1203 = vmatmul.mubr.bf16.gmra.mrb[84].mxu0 %v823_v41  ;;  %1364 = vmatmul.mubr.bf16.gmra.mrb[84].mxu1 %v825_v42  ;;  %v723_v3 = vmax.f32 %v384_v47, 0.0 }
 0x129   :  { %v726_v63 = vmax.f32 %v579_v52, 0.0  ;;  %v390_v0 = vadd.f32 %v389_v61, %v2723_v58  ;;  %v583_v2 = vadd.f32 %v582_v62, %v2725_v59  ;;  %v724_v6 = vmax.f32 %v386_v51, 0.0 }
 0x12a   :  { %v727_v4 = vmax.f32 %v388_v55, 0.0  ;;  %v729_v5 = vmax.f32 %v581_v60, 0.0 }
 0x12b   :  { %v728_v7 = vmax.f32 %v390_v0, 0.0  ;;  %v730_v8 = vmax.f32 %v583_v2, 0.0 }
 0x12c   :  { %v827_v9 = vpack.c.bf16 %v727_v4, %v723_v3  ;;  %v829_v10 = vpack.c.bf16 %v729_v5, %v725_v1 }
 0x12d   :  { %v828_v11 = vpack.c.bf16 %v728_v7, %v724_v6  ;;  %v830_v12 = vpack.c.bf16 %v730_v8, %v726_v63  ;;  %v393_v13 = vpop.f32.mrb[28].mxu0  ;;  %v586_v14 = vpop.f32.mrb[28].mxu1 }
 0x12e   :  { %v394_v15 = vadd.f32 %v393_v13, %v2719_v56  ;;  %v587_v16 = vadd.f32 %v586_v14, %v2721_v57  ;;  %v395_v17 = vpop.f32.mrb[29].mxu0  ;;  %v588_v18 = vpop.f32.mrb[29].mxu1 }
 0x12f   :  { %v396_v19 = vadd.f32 %v395_v17, %v2723_v58  ;;  %v589_v20 = vadd.f32 %v588_v18, %v2725_v59  ;;  %v397_v21 = vpop.f32.mrb[30].mxu0  ;;  %v590_v22 = vpop.f32.mrb[30].mxu1  ;;  %1210 = vmatprep.mubr.bf16.mxu0 %v828_v11  ;;  %1371 = vmatprep.mubr.bf16.mxu1 %v830_v12 }
 0x130   :  { %v733_v23 = vmax.f32 %v587_v16, 0.0  ;;  %v398_v24 = vadd.f32 %v397_v21, %v2719_v56  ;;  %v591_v25 = vadd.f32 %v590_v22, %v2721_v57  ;;  %v399_v26 = vpop.f32.mrb[31].mxu0  ;;  %v592_v27 = vpop.f32.mrb[31].mxu1  ;;  %1211 = vmatmul.mubr.bf16.gmra.mrb[88].mxu0 %v827_v9  ;;  %1372 = vmatmul.mubr.bf16.gmra.mrb[88].mxu1 %v829_v10  ;;  %v731_v31 = vmax.f32 %v394_v15, 0.0 }
 0x131   :  { %v734_v28 = vmax.f32 %v589_v20, 0.0  ;;  %v400_v29 = vadd.f32 %v399_v26, %v2723_v58  ;;  %v593_v30 = vadd.f32 %v592_v27, %v2725_v59  ;;  %v732_v34 = vmax.f32 %v396_v19, 0.0 }
 0x132   :  { %v735_v32 = vmax.f32 %v398_v24, 0.0  ;;  %v737_v33 = vmax.f32 %v591_v25, 0.0 }
 0x133   :  { %v736_v35 = vmax.f32 %v400_v29, 0.0  ;;  %v738_v36 = vmax.f32 %v593_v30, 0.0 }
 0x134   :  { %v831_v37 = vpack.c.bf16 %v735_v32, %v731_v31  ;;  %v833_v38 = vpack.c.bf16 %v737_v33, %v733_v23 }
 0x135   :  { %v832_v39 = vpack.c.bf16 %v736_v35, %v732_v34  ;;  %v834_v40 = vpack.c.bf16 %v738_v36, %v734_v28  ;;  %v403_v41 = vpop.f32.mrb[32].mxu0  ;;  %v596_v42 = vpop.f32.mrb[32].mxu1 }
 0x136   :  { %v404_v43 = vadd.f32 %v403_v41, %v2719_v56  ;;  %v597_v44 = vadd.f32 %v596_v42, %v2721_v57  ;;  %v405_v45 = vpop.f32.mrb[33].mxu0  ;;  %v598_v46 = vpop.f32.mrb[33].mxu1 }
 0x137   :  { %v406_v47 = vadd.f32 %v405_v45, %v2723_v58  ;;  %v599_v48 = vadd.f32 %v598_v46, %v2725_v59  ;;  %v407_v49 = vpop.f32.mrb[34].mxu0  ;;  %v600_v50 = vpop.f32.mrb[34].mxu1  ;;  %1218 = vmatprep.mubr.bf16.mxu0 %v832_v39  ;;  %1379 = vmatprep.mubr.bf16.mxu1 %v834_v40 }
 0x138   :  { %v741_v51 = vmax.f32 %v597_v44, 0.0  ;;  %v408_v52 = vadd.f32 %v407_v49, %v2719_v56  ;;  %v601_v53 = vadd.f32 %v600_v50, %v2721_v57  ;;  %v409_v54 = vpop.f32.mrb[35].mxu0  ;;  %v602_v1 = vpop.f32.mrb[35].mxu1  ;;  %1219 = vmatmul.mubr.bf16.gmra.mrb[92].mxu0 %v831_v37  ;;  %1380 = vmatmul.mubr.bf16.gmra.mrb[92].mxu1 %v833_v38  ;;  %v739_v62 = vmax.f32 %v404_v43, 0.0 }
 0x139   :  { %v742_v55 = vmax.f32 %v599_v48, 0.0  ;;  %v410_v60 = vadd.f32 %v409_v54, %v2723_v58  ;;  %v603_v61 = vadd.f32 %v602_v1, %v2725_v59  ;;  %v740_v2 = vmax.f32 %v406_v47, 0.0 }
 0x13a   :  { %v743_v63 = vmax.f32 %v408_v52, 0.0  ;;  %v745_v0 = vmax.f32 %v601_v53, 0.0 }
 0x13b   :  { %v744_v3 = vmax.f32 %v410_v60, 0.0  ;;  %v746_v4 = vmax.f32 %v603_v61, 0.0 }
 0x13c   :  { %v835_v5 = vpack.c.bf16 %v743_v63, %v739_v62  ;;  %v837_v6 = vpack.c.bf16 %v745_v0, %v741_v51 }
 0x13d   :  { %v836_v7 = vpack.c.bf16 %v744_v3, %v740_v2  ;;  %v838_v8 = vpack.c.bf16 %v746_v4, %v742_v55  ;;  %v413_v9 = vpop.f32.mrb[36].mxu0  ;;  %v606_v10 = vpop.f32.mrb[36].mxu1 }
 0x13e   :  { %v414_v11 = vadd.f32 %v413_v9, %v2719_v56  ;;  %v607_v12 = vadd.f32 %v606_v10, %v2721_v57  ;;  %v415_v13 = vpop.f32.mrb[37].mxu0  ;;  %v608_v14 = vpop.f32.mrb[37].mxu1 }
 0x13f   :  { %v416_v15 = vadd.f32 %v415_v13, %v2723_v58  ;;  %v609_v16 = vadd.f32 %v608_v14, %v2725_v59  ;;  %v417_v17 = vpop.f32.mrb[38].mxu0  ;;  %v610_v18 = vpop.f32.mrb[38].mxu1  ;;  %1226 = vmatprep.mubr.bf16.mxu0 %v836_v7  ;;  %1387 = vmatprep.mubr.bf16.mxu1 %v838_v8 }
 0x140   :  { %v749_v19 = vmax.f32 %v607_v12, 0.0  ;;  %v418_v20 = vadd.f32 %v417_v17, %v2719_v56  ;;  %v611_v21 = vadd.f32 %v610_v18, %v2721_v57  ;;  %v419_v22 = vpop.f32.mrb[39].mxu0  ;;  %v612_v23 = vpop.f32.mrb[39].mxu1  ;;  %1227 = vmatmul.mubr.bf16.gmra.mrb[96].mxu0 %v835_v5  ;;  %1388 = vmatmul.mubr.bf16.gmra.mrb[96].mxu1 %v837_v6  ;;  %v747_v27 = vmax.f32 %v414_v11, 0.0 }
 0x141   :  { %v750_v24 = vmax.f32 %v609_v16, 0.0  ;;  %v420_v25 = vadd.f32 %v419_v22, %v2723_v58  ;;  %v613_v26 = vadd.f32 %v612_v23, %v2725_v59  ;;  %v748_v30 = vmax.f32 %v416_v15, 0.0 }
 0x142   :  { %v751_v28 = vmax.f32 %v418_v20, 0.0  ;;  %v753_v29 = vmax.f32 %v611_v21, 0.0 }
 0x143   :  { %v752_v31 = vmax.f32 %v420_v25, 0.0  ;;  %v754_v32 = vmax.f32 %v613_v26, 0.0 }
 0x144   :  { %v839_v33 = vpack.c.bf16 %v751_v28, %v747_v27  ;;  %v841_v34 = vpack.c.bf16 %v753_v29, %v749_v19 }
 0x145   :  { %v840_v35 = vpack.c.bf16 %v752_v31, %v748_v30  ;;  %v842_v36 = vpack.c.bf16 %v754_v32, %v750_v24  ;;  %v423_v37 = vpop.f32.mrb[40].mxu0  ;;  %v616_v38 = vpop.f32.mrb[40].mxu1 }
 0x146   :  { %v424_v39 = vadd.f32 %v423_v37, %v2719_v56  ;;  %v617_v40 = vadd.f32 %v616_v38, %v2721_v57  ;;  %v425_v41 = vpop.f32.mrb[41].mxu0  ;;  %v618_v42 = vpop.f32.mrb[41].mxu1 }
 0x147   :  { %v426_v43 = vadd.f32 %v425_v41, %v2723_v58  ;;  %v619_v44 = vadd.f32 %v618_v42, %v2725_v59  ;;  %v427_v45 = vpop.f32.mrb[42].mxu0  ;;  %v620_v46 = vpop.f32.mrb[42].mxu1  ;;  %1234 = vmatprep.mubr.bf16.mxu0 %v840_v35  ;;  %1395 = vmatprep.mubr.bf16.mxu1 %v842_v36 }
 0x148   :  { %v757_v47 = vmax.f32 %v617_v40, 0.0  ;;  %v428_v48 = vadd.f32 %v427_v45, %v2719_v56  ;;  %v621_v49 = vadd.f32 %v620_v46, %v2721_v57  ;;  %v429_v50 = vpop.f32.mrb[43].mxu0  ;;  %v622_v51 = vpop.f32.mrb[43].mxu1  ;;  %1235 = vmatmul.mubr.bf16.gmra.mrb[100].mxu0 %v839_v33  ;;  %1396 = vmatmul.mubr.bf16.gmra.mrb[100].mxu1 %v841_v34  ;;  %v755_v1 = vmax.f32 %v424_v39, 0.0 }
 0x149   :  { %v758_v52 = vmax.f32 %v619_v44, 0.0  ;;  %v430_v53 = vadd.f32 %v429_v50, %v2723_v58  ;;  %v623_v54 = vadd.f32 %v622_v51, %v2725_v59  ;;  %v756_v61 = vmax.f32 %v426_v43, 0.0 }
 0x14a   :  { %v759_v55 = vmax.f32 %v428_v48, 0.0  ;;  %v761_v60 = vmax.f32 %v621_v49, 0.0 }
 0x14b   :  { %v760_v62 = vmax.f32 %v430_v53, 0.0  ;;  %v762_v63 = vmax.f32 %v623_v54, 0.0 }
 0x14c   :  { %v843_v0 = vpack.c.bf16 %v759_v55, %v755_v1  ;;  %v845_v2 = vpack.c.bf16 %v761_v60, %v757_v47 }
 0x14d   :  { %v844_v3 = vpack.c.bf16 %v760_v62, %v756_v61  ;;  %v846_v4 = vpack.c.bf16 %v762_v63, %v758_v52  ;;  %v433_v5 = vpop.f32.mrb[44].mxu0  ;;  %v626_v6 = vpop.f32.mrb[44].mxu1 }
 0x14e   :  { %v434_v7 = vadd.f32 %v433_v5, %v2719_v56  ;;  %v627_v8 = vadd.f32 %v626_v6, %v2721_v57  ;;  %v435_v9 = vpop.f32.mrb[45].mxu0  ;;  %v628_v10 = vpop.f32.mrb[45].mxu1 }
 0x14f   :  { %v436_v11 = vadd.f32 %v435_v9, %v2723_v58  ;;  %v629_v12 = vadd.f32 %v628_v10, %v2725_v59  ;;  %v437_v13 = vpop.f32.mrb[46].mxu0  ;;  %v630_v14 = vpop.f32.mrb[46].mxu1  ;;  %1242 = vmatprep.mubr.bf16.mxu0 %v844_v3  ;;  %1403 = vmatprep.mubr.bf16.mxu1 %v846_v4 }
 0x150   :  { %v765_v15 = vmax.f32 %v627_v8, 0.0  ;;  %v438_v16 = vadd.f32 %v437_v13, %v2719_v56  ;;  %v631_v17 = vadd.f32 %v630_v14, %v2721_v57  ;;  %v439_v18 = vpop.f32.mrb[47].mxu0  ;;  %v632_v19 = vpop.f32.mrb[47].mxu1  ;;  %1243 = vmatmul.mubr.bf16.gmra.mrb[104].mxu0 %v843_v0  ;;  %1404 = vmatmul.mubr.bf16.gmra.mrb[104].mxu1 %v845_v2  ;;  %v763_v23 = vmax.f32 %v434_v7, 0.0 }
 0x151   :  { %v766_v20 = vmax.f32 %v629_v12, 0.0  ;;  %v440_v21 = vadd.f32 %v439_v18, %v2723_v58  ;;  %v633_v22 = vadd.f32 %v632_v19, %v2725_v59  ;;  %v764_v26 = vmax.f32 %v436_v11, 0.0 }
 0x152   :  { %v767_v24 = vmax.f32 %v438_v16, 0.0  ;;  %v769_v25 = vmax.f32 %v631_v17, 0.0 }
 0x153   :  { %v768_v27 = vmax.f32 %v440_v21, 0.0  ;;  %v770_v28 = vmax.f32 %v633_v22, 0.0 }
 0x154   :  { %v847_v29 = vpack.c.bf16 %v767_v24, %v763_v23  ;;  %v849_v30 = vpack.c.bf16 %v769_v25, %v765_v15 }
 0x155   :  { %v848_v31 = vpack.c.bf16 %v768_v27, %v764_v26  ;;  %v850_v32 = vpack.c.bf16 %v770_v28, %v766_v20  ;;  %v443_v33 = vpop.f32.mrb[48].mxu0  ;;  %v636_v34 = vpop.f32.mrb[48].mxu1 }
 0x156   :  { %v444_v35 = vadd.f32 %v443_v33, %v2719_v56  ;;  %v637_v36 = vadd.f32 %v636_v34, %v2721_v57  ;;  %v445_v37 = vpop.f32.mrb[49].mxu0  ;;  %v638_v38 = vpop.f32.mrb[49].mxu1 }
 0x157   :  { %v446_v39 = vadd.f32 %v445_v37, %v2723_v58  ;;  %v639_v40 = vadd.f32 %v638_v38, %v2725_v59  ;;  %v447_v41 = vpop.f32.mrb[50].mxu0  ;;  %v640_v42 = vpop.f32.mrb[50].mxu1  ;;  %1250 = vmatprep.mubr.bf16.mxu0 %v848_v31  ;;  %1411 = vmatprep.mubr.bf16.mxu1 %v850_v32 }
 0x158   :  { %v773_v43 = vmax.f32 %v637_v36, 0.0  ;;  %v448_v44 = vadd.f32 %v447_v41, %v2719_v56  ;;  %v641_v45 = vadd.f32 %v640_v42, %v2721_v57  ;;  %v449_v46 = vpop.f32.mrb[51].mxu0  ;;  %v642_v47 = vpop.f32.mrb[51].mxu1  ;;  %1251 = vmatmul.mubr.bf16.gmra.mrb[108].mxu0 %v847_v29  ;;  %1412 = vmatmul.mubr.bf16.gmra.mrb[108].mxu1 %v849_v30  ;;  %v771_v51 = vmax.f32 %v444_v35, 0.0 }
 0x159   :  { %v774_v48 = vmax.f32 %v639_v40, 0.0  ;;  %v450_v49 = vadd.f32 %v449_v46, %v2723_v58  ;;  %v643_v50 = vadd.f32 %v642_v47, %v2725_v59  ;;  %v772_v54 = vmax.f32 %v446_v39, 0.0 }
 0x15a   :  { %v775_v52 = vmax.f32 %v448_v44, 0.0  ;;  %v777_v53 = vmax.f32 %v641_v45, 0.0 }
 0x15b   :  { %v776_v1 = vmax.f32 %v450_v49, 0.0  ;;  %v778_v55 = vmax.f32 %v643_v50, 0.0 }
 0x15c   :  { %v851_v60 = vpack.c.bf16 %v775_v52, %v771_v51  ;;  %v853_v61 = vpack.c.bf16 %v777_v53, %v773_v43 }
 0x15d   :  { %v852_v62 = vpack.c.bf16 %v776_v1, %v772_v54  ;;  %v854_v63 = vpack.c.bf16 %v778_v55, %v774_v48  ;;  %v453_v0 = vpop.f32.mrb[52].mxu0  ;;  %v646_v2 = vpop.f32.mrb[52].mxu1 }
 0x15e   :  { %v454_v3 = vadd.f32 %v453_v0, %v2719_v56  ;;  %v647_v4 = vadd.f32 %v646_v2, %v2721_v57  ;;  %v455_v5 = vpop.f32.mrb[53].mxu0  ;;  %v648_v6 = vpop.f32.mrb[53].mxu1 }
 0x15f   :  { %v456_v7 = vadd.f32 %v455_v5, %v2723_v58  ;;  %v649_v8 = vadd.f32 %v648_v6, %v2725_v59  ;;  %v457_v9 = vpop.f32.mrb[54].mxu0  ;;  %v650_v10 = vpop.f32.mrb[54].mxu1  ;;  %1258 = vmatprep.mubr.bf16.mxu0 %v852_v62  ;;  %1419 = vmatprep.mubr.bf16.mxu1 %v854_v63 }
 0x160   :  { %v781_v11 = vmax.f32 %v647_v4, 0.0  ;;  %v458_v12 = vadd.f32 %v457_v9, %v2719_v56  ;;  %v651_v13 = vadd.f32 %v650_v10, %v2721_v57  ;;  %v459_v14 = vpop.f32.mrb[55].mxu0  ;;  %v652_v15 = vpop.f32.mrb[55].mxu1  ;;  %1259 = vmatmul.mubr.bf16.gmra.mrb[112].mxu0 %v851_v60  ;;  %1420 = vmatmul.mubr.bf16.gmra.mrb[112].mxu1 %v853_v61  ;;  %v779_v19 = vmax.f32 %v454_v3, 0.0 }
 0x161   :  { %v782_v16 = vmax.f32 %v649_v8, 0.0  ;;  %v460_v17 = vadd.f32 %v459_v14, %v2723_v58  ;;  %v653_v18 = vadd.f32 %v652_v15, %v2725_v59  ;;  %v780_v22 = vmax.f32 %v456_v7, 0.0 }
 0x162   :  { %v783_v20 = vmax.f32 %v458_v12, 0.0  ;;  %v785_v21 = vmax.f32 %v651_v13, 0.0 }
 0x163   :  { %v784_v23 = vmax.f32 %v460_v17, 0.0  ;;  %v786_v24 = vmax.f32 %v653_v18, 0.0 }
 0x164   :  { %v855_v25 = vpack.c.bf16 %v783_v20, %v779_v19  ;;  %v857_v26 = vpack.c.bf16 %v785_v21, %v781_v11 }
 0x165   :  { %v856_v27 = vpack.c.bf16 %v784_v23, %v780_v22  ;;  %v858_v28 = vpack.c.bf16 %v786_v24, %v782_v16  ;;  %v463_v29 = vpop.f32.mrb[56].mxu0  ;;  %v656_v30 = vpop.f32.mrb[56].mxu1 }
 0x166   :  { %v464_v31 = vadd.f32 %v463_v29, %v2719_v56  ;;  %v657_v32 = vadd.f32 %v656_v30, %v2721_v57  ;;  %v465_v33 = vpop.f32.mrb[57].mxu0  ;;  %v658_v34 = vpop.f32.mrb[57].mxu1 }
 0x167   :  { %v466_v35 = vadd.f32 %v465_v33, %v2723_v58  ;;  %v659_v36 = vadd.f32 %v658_v34, %v2725_v59  ;;  %v467_v37 = vpop.f32.mrb[58].mxu0  ;;  %v660_v38 = vpop.f32.mrb[58].mxu1  ;;  %1266 = vmatprep.mubr.bf16.mxu0 %v856_v27  ;;  %1427 = vmatprep.mubr.bf16.mxu1 %v858_v28 }
 0x168   :  { %v789_v39 = vmax.f32 %v657_v32, 0.0  ;;  %v468_v40 = vadd.f32 %v467_v37, %v2719_v56  ;;  %v661_v41 = vadd.f32 %v660_v38, %v2721_v57  ;;  %v469_v42 = vpop.f32.mrb[59].mxu0  ;;  %v662_v43 = vpop.f32.mrb[59].mxu1  ;;  %1267 = vmatmul.mubr.bf16.gmra.mrb[116].mxu0 %v855_v25  ;;  %1428 = vmatmul.mubr.bf16.gmra.mrb[116].mxu1 %v857_v26  ;;  %v787_v47 = vmax.f32 %v464_v31, 0.0 }
 0x169   :  { %v790_v44 = vmax.f32 %v659_v36, 0.0  ;;  %v470_v45 = vadd.f32 %v469_v42, %v2723_v58  ;;  %v663_v46 = vadd.f32 %v662_v43, %v2725_v59  ;;  %v788_v50 = vmax.f32 %v466_v35, 0.0 }
 0x16a   :  { %v791_v48 = vmax.f32 %v468_v40, 0.0  ;;  %v793_v49 = vmax.f32 %v661_v41, 0.0 }
 0x16b   :  { %v792_v51 = vmax.f32 %v470_v45, 0.0  ;;  %v794_v52 = vmax.f32 %v663_v46, 0.0 }
 0x16c   :  { %v859_v53 = vpack.c.bf16 %v791_v48, %v787_v47  ;;  %v861_v54 = vpack.c.bf16 %v793_v49, %v789_v39 }
 0x16d   :  { %v860_v1 = vpack.c.bf16 %v792_v51, %v788_v50  ;;  %v862_v55 = vpack.c.bf16 %v794_v52, %v790_v44  ;;  %v473_v60 = vpop.f32.mrb[60].mxu0  ;;  %v666_v61 = vpop.f32.mrb[60].mxu1 }
 0x16e   :  { %v474_v62 = vadd.f32 %v473_v60, %v2719_v56  ;;  %v667_v63 = vadd.f32 %v666_v61, %v2721_v57  ;;  %v475_v0 = vpop.f32.mrb[61].mxu0  ;;  %v668_v2 = vpop.f32.mrb[61].mxu1 }
 0x16f   :  { %v476_v3 = vadd.f32 %v475_v0, %v2723_v58  ;;  %v669_v4 = vadd.f32 %v668_v2, %v2725_v59  ;;  %v477_v5 = vpop.f32.mrb[62].mxu0  ;;  %v670_v6 = vpop.f32.mrb[62].mxu1  ;;  %1274 = vmatprep.mubr.bf16.mxu0 %v860_v1  ;;  %1435 = vmatprep.mubr.bf16.mxu1 %v862_v55 }
 0x170   :  { %v797_v7 = vmax.f32 %v667_v63, 0.0  ;;  %v478_v8 = vadd.f32 %v477_v5, %v2719_v56  ;;  %v671_v9 = vadd.f32 %v670_v6, %v2721_v57  ;;  %v479_v10 = vpop.f32.mrb[63].mxu0  ;;  %v672_v11 = vpop.f32.mrb[63].mxu1  ;;  %1275 = vmatmul.mubr.bf16.gmra.mrb[120].mxu0 %v859_v53  ;;  %1436 = vmatmul.mubr.bf16.gmra.mrb[120].mxu1 %v861_v54  ;;  %v795_v15 = vmax.f32 %v474_v62, 0.0 }
 0x171   :  { %v798_v12 = vmax.f32 %v669_v4, 0.0  ;;  %v480_v13 = vadd.f32 %v479_v10, %v2723_v58  ;;  %v673_v14 = vadd.f32 %v672_v11, %v2725_v59  ;;  %v796_v18 = vmax.f32 %v476_v3, 0.0  ;;  %v2858_v58 = vld [vmem:[%s3354_s4] ss:$0 sm:$0xff] }
 0x172   :  { %v799_v16 = vmax.f32 %v478_v8, 0.0  ;;  %v801_v17 = vmax.f32 %v671_v9, 0.0 }
 0x173   :  { %v800_v19 = vmax.f32 %v480_v13, 0.0  ;;  %v802_v20 = vmax.f32 %v673_v14, 0.0 }
 0x174   :  { %v863_v21 = vpack.c.bf16 %v799_v16, %v795_v15  ;;  %v865_v22 = vpack.c.bf16 %v801_v17, %v797_v7 }
 0x175   :  { %v864_v56 = vpack.c.bf16 %v800_v19, %v796_v18  ;;  %v866_v23 = vpack.c.bf16 %v802_v20, %v798_v12 }
 0x177   :  { %1282 = vmatprep.mubr.bf16.mxu0 %v864_v56  ;;  %1443 = vmatprep.mubr.bf16.mxu1 %v866_v23 }
 0x178   :  { %1283 = vmatmul.mubr.bf16.gmra.mrb[124].mxu0 %v863_v21  ;;  %1444 = vmatmul.mubr.bf16.gmra.mrb[124].mxu1 %v865_v22 }
 0x1d3   :  { %v2002_v57 = vpop.f32.mrb[64].mxu0  ;;  %v2114_v24 = vpop.f32.mrb[64].mxu1 }
 0x1d4   :  { %v2003_v59 = vpop.f32.mrb[65].mxu0  ;;  %v2115_v25 = vpop.f32.mrb[65].mxu1 }
 0x1d5   :  { %v2004_v26 = vadd.f32 %v2003_v59, %v2002_v57  ;;  %v2116_v27 = vadd.f32 %v2115_v25, %v2114_v24  ;;  %v2005_v28 = vpop.f32.mrb[66].mxu0  ;;  %v2117_v29 = vpop.f32.mrb[66].mxu1 }
 0x1d6   :  { %v2006_v30 = vpop.f32.mrb[67].mxu0  ;;  %v2118_v31 = vpop.f32.mrb[67].mxu1 }
 0x1d7   :  { %v1165_v32 = vadd.f32 %v2004_v26, %v2858_v58  ;;  %v2007_v33 = vadd.f32 %v2006_v30, %v2005_v28  ;;  %v2119_v34 = vadd.f32 %v2118_v31, %v2117_v29 }
 0x1d9   :  { %v1168_v35 = vadd.f32 %v2007_v33, %v2858_v58  ;;  %v2862_v36 = vadd.f32 %v2116_v27, %v1165_v32 }
 0x1db   :  { %v2008_v37 = vpop.f32.mrb[68].mxu0  ;;  %v2120_v38 = vpop.f32.mrb[68].mxu1  ;;  %1452 = vadd.xlane.f32.xlu0 %v2862_v36  ;;  %v2865_v39 = vadd.f32 %v2119_v34, %v1168_v35 }
 0x1dc   :  { %v2009_v40 = vpop.f32.mrb[69].mxu0  ;;  %v2121_v41 = vpop.f32.mrb[69].mxu1 }
 0x1dd   :  { %v2010_v42 = vadd.f32 %v2009_v40, %v2008_v37  ;;  %v2122_v43 = vadd.f32 %v2121_v41, %v2120_v38  ;;  %v2011_v44 = vpop.f32.mrb[70].mxu0  ;;  %v2123_v45 = vpop.f32.mrb[70].mxu1 }
 0x1de   :  { %v2012_v46 = vpop.f32.mrb[71].mxu0  ;;  %v2124_v47 = vpop.f32.mrb[71].mxu1 }
 0x1df   :  { %v1173_v48 = vadd.f32 %v2010_v42, %v2858_v58  ;;  %v2013_v49 = vadd.f32 %v2012_v46, %v2011_v44  ;;  %v2125_v50 = vadd.f32 %v2124_v47, %v2123_v45  ;;  %1454 = vadd.xlane.f32.xlu0 %v2865_v39 }
 0x1e1   :  { %v1176_v51 = vadd.f32 %v2013_v49, %v2858_v58  ;;  %v2870_v52 = vadd.f32 %v2122_v43, %v1173_v48 }
 0x1e3   :  { %v2014_v53 = vpop.f32.mrb[72].mxu0  ;;  %v2126_v54 = vpop.f32.mrb[72].mxu1  ;;  %1456 = vadd.xlane.f32.xlu1 %v2870_v52  ;;  %v2873_v1 = vadd.f32 %v2125_v50, %v1176_v51 }
 0x1e4   :  { %v2015_v55 = vpop.f32.mrb[73].mxu0  ;;  %v2127_v60 = vpop.f32.mrb[73].mxu1 }
 0x1e5   :  { %v2016_v61 = vadd.f32 %v2015_v55, %v2014_v53  ;;  %v2128_v62 = vadd.f32 %v2127_v60, %v2126_v54  ;;  %v2017_v63 = vpop.f32.mrb[74].mxu0  ;;  %v2129_v0 = vpop.f32.mrb[74].mxu1 }
 0x1e6   :  { %v2018_v2 = vpop.f32.mrb[75].mxu0  ;;  %v2130_v3 = vpop.f32.mrb[75].mxu1 }
 0x1e7   :  { %v1181_v4 = vadd.f32 %v2016_v61, %v2858_v58  ;;  %v2019_v5 = vadd.f32 %v2018_v2, %v2017_v63  ;;  %v2131_v6 = vadd.f32 %v2130_v3, %v2129_v0  ;;  %1458 = vadd.xlane.f32.xlu1 %v2873_v1 }
 0x1e9   :  { %v1184_v7 = vadd.f32 %v2019_v5, %v2858_v58  ;;  %v2878_v8 = vadd.f32 %v2128_v62, %v1181_v4 }
 0x1eb   :  { %v2020_v9 = vpop.f32.mrb[76].mxu0  ;;  %v2132_v10 = vpop.f32.mrb[76].mxu1  ;;  %1460 = vadd.xlane.f32.xlu0 %v2878_v8  ;;  %v2881_v11 = vadd.f32 %v2131_v6, %v1184_v7 }
 0x1ec   :  { %v2021_v12 = vpop.f32.mrb[77].mxu0  ;;  %v2133_v13 = vpop.f32.mrb[77].mxu1 }
 0x1ed   :  { %v2022_v14 = vadd.f32 %v2021_v12, %v2020_v9  ;;  %v2134_v15 = vadd.f32 %v2133_v13, %v2132_v10  ;;  %v2023_v16 = vpop.f32.mrb[78].mxu0  ;;  %v2135_v17 = vpop.f32.mrb[78].mxu1  ;;  %1462 = vadd.xlane.f32.xlu1 %v2881_v11 }
 0x1ee   :  { %v2024_v18 = vpop.f32.mrb[79].mxu0  ;;  %v2136_v19 = vpop.f32.mrb[79].mxu1 }
 0x1ef   :  { %v1189_v20 = vadd.f32 %v2022_v14, %v2858_v58  ;;  %v2025_v21 = vadd.f32 %v2024_v18, %v2023_v16  ;;  %v2137_v22 = vadd.f32 %v2136_v19, %v2135_v17 }
 0x1f1   :  { %v1192_v56 = vadd.f32 %v2025_v21, %v2858_v58  ;;  %v2886_v23 = vadd.f32 %v2134_v15, %v1189_v20 }
 0x1f3   :  { %v2026_v57 = vpop.f32.mrb[80].mxu0  ;;  %v2138_v24 = vpop.f32.mrb[80].mxu1  ;;  %1464 = vadd.xlane.f32.xlu0 %v2886_v23  ;;  %v2889_v59 = vadd.f32 %v2137_v22, %v1192_v56 }
 0x1f4   :  { %v2027_v25 = vpop.f32.mrb[81].mxu0  ;;  %v2139_v26 = vpop.f32.mrb[81].mxu1 }
 0x1f5   :  { %v2028_v27 = vadd.f32 %v2027_v25, %v2026_v57  ;;  %v2140_v28 = vadd.f32 %v2139_v26, %v2138_v24  ;;  %v2029_v29 = vpop.f32.mrb[82].mxu0  ;;  %v2141_v30 = vpop.f32.mrb[82].mxu1  ;;  %1466 = vadd.xlane.f32.xlu1 %v2889_v59 }
 0x1f6   :  { %v2030_v31 = vpop.f32.mrb[83].mxu0  ;;  %v2142_v32 = vpop.f32.mrb[83].mxu1 }
 0x1f7   :  { %v1197_v33 = vadd.f32 %v2028_v27, %v2858_v58  ;;  %v2031_v34 = vadd.f32 %v2030_v31, %v2029_v29  ;;  %v2143_v35 = vadd.f32 %v2142_v32, %v2141_v30 }
 0x1f9   :  { %v1200_v37 = vadd.f32 %v2031_v34, %v2858_v58  ;;  %v2894_v38 = vadd.f32 %v2140_v28, %v1197_v33 }
 0x1fb   :  { %v2032_v40 = vpop.f32.mrb[84].mxu0  ;;  %v2144_v41 = vpop.f32.mrb[84].mxu1  ;;  %1468 = vadd.xlane.f32.xlu0 %v2894_v38  ;;  %v2897_v42 = vadd.f32 %v2143_v35, %v1200_v37 }
 0x1fc   :  { %v2033_v43 = vpop.f32.mrb[85].mxu0  ;;  %v2145_v44 = vpop.f32.mrb[85].mxu1 }
 0x1fd   :  { %v2034_v45 = vadd.f32 %v2033_v43, %v2032_v40  ;;  %v2146_v46 = vadd.f32 %v2145_v44, %v2144_v41  ;;  %v2035_v47 = vpop.f32.mrb[86].mxu0  ;;  %v2147_v48 = vpop.f32.mrb[86].mxu1  ;;  %1470 = vadd.xlane.f32.xlu1 %v2897_v42 }
 0x1fe   :  { %v2036_v49 = vpop.f32.mrb[87].mxu0  ;;  %v2148_v50 = vpop.f32.mrb[87].mxu1 }
 0x1ff   :  { %v1205_v51 = vadd.f32 %v2034_v45, %v2858_v58  ;;  %v2037_v53 = vadd.f32 %v2036_v49, %v2035_v47  ;;  %v2149_v54 = vadd.f32 %v2148_v50, %v2147_v48 }
 0x201   :  { %v1208_v55 = vadd.f32 %v2037_v53, %v2858_v58  ;;  %v2902_v60 = vadd.f32 %v2146_v46, %v1205_v51 }
 0x203   :  { %v2038_v61 = vpop.f32.mrb[88].mxu0  ;;  %v2150_v62 = vpop.f32.mrb[88].mxu1  ;;  %1472 = vadd.xlane.f32.xlu0 %v2902_v60  ;;  %v2905_v63 = vadd.f32 %v2149_v54, %v1208_v55 }
 0x204   :  { %v2039_v0 = vpop.f32.mrb[89].mxu0  ;;  %v2151_v2 = vpop.f32.mrb[89].mxu1 }
 0x205   :  { %v2040_v3 = vadd.f32 %v2039_v0, %v2038_v61  ;;  %v2152_v4 = vadd.f32 %v2151_v2, %v2150_v62  ;;  %v2041_v5 = vpop.f32.mrb[90].mxu0  ;;  %v2153_v6 = vpop.f32.mrb[90].mxu1  ;;  %1474 = vadd.xlane.f32.xlu1 %v2905_v63 }
 0x206   :  { %v2042_v7 = vpop.f32.mrb[91].mxu0  ;;  %v2154_v9 = vpop.f32.mrb[91].mxu1 }
 0x207   :  { %v1213_v10 = vadd.f32 %v2040_v3, %v2858_v58  ;;  %v2043_v12 = vadd.f32 %v2042_v7, %v2041_v5  ;;  %v2155_v13 = vadd.f32 %v2154_v9, %v2153_v6 }
 0x209   :  { %v1216_v14 = vadd.f32 %v2043_v12, %v2858_v58  ;;  %v2910_v15 = vadd.f32 %v2152_v4, %v1213_v10 }
 0x20b   :  { %v2044_v16 = vpop.f32.mrb[92].mxu0  ;;  %v2156_v17 = vpop.f32.mrb[92].mxu1  ;;  %1476 = vadd.xlane.f32.xlu0 %v2910_v15  ;;  %v2913_v18 = vadd.f32 %v2155_v13, %v1216_v14 }
 0x20c   :  { %v2045_v19 = vpop.f32.mrb[93].mxu0  ;;  %v2157_v20 = vpop.f32.mrb[93].mxu1 }
 0x20d   :  { %v2046_v21 = vadd.f32 %v2045_v19, %v2044_v16  ;;  %v2158_v22 = vadd.f32 %v2157_v20, %v2156_v17  ;;  %v2047_v56 = vpop.f32.mrb[94].mxu0  ;;  %v2159_v57 = vpop.f32.mrb[94].mxu1  ;;  %1478 = vadd.xlane.f32.xlu1 %v2913_v18 }
 0x20e   :  { %v2048_v24 = vpop.f32.mrb[95].mxu0  ;;  %v2160_v25 = vpop.f32.mrb[95].mxu1 }
 0x20f   :  { %v1221_v26 = vadd.f32 %v2046_v21, %v2858_v58  ;;  %v2049_v27 = vadd.f32 %v2048_v24, %v2047_v56  ;;  %v2161_v28 = vadd.f32 %v2160_v25, %v2159_v57 }
 0x211   :  { %v1224_v29 = vadd.f32 %v2049_v27, %v2858_v58  ;;  %v2918_v30 = vadd.f32 %v2158_v22, %v1221_v26 }
 0x213   :  { %v2050_v31 = vpop.f32.mrb[96].mxu0  ;;  %v2162_v32 = vpop.f32.mrb[96].mxu1  ;;  %1480 = vadd.xlane.f32.xlu0 %v2918_v30  ;;  %v2921_v33 = vadd.f32 %v2161_v28, %v1224_v29 }
 0x214   :  { %v2051_v34 = vpop.f32.mrb[97].mxu0  ;;  %v2163_v35 = vpop.f32.mrb[97].mxu1 }
 0x215   :  { %v2052_v37 = vadd.f32 %v2051_v34, %v2050_v31  ;;  %v2164_v40 = vadd.f32 %v2163_v35, %v2162_v32  ;;  %v2053_v41 = vpop.f32.mrb[98].mxu0  ;;  %v2165_v43 = vpop.f32.mrb[98].mxu1  ;;  %1482 = vadd.xlane.f32.xlu1 %v2921_v33 }
 0x216   :  { %v2054_v44 = vpop.f32.mrb[99].mxu0  ;;  %v2166_v45 = vpop.f32.mrb[99].mxu1 }
 0x217   :  { %v1229_v46 = vadd.f32 %v2052_v37, %v2858_v58  ;;  %v2055_v47 = vadd.f32 %v2054_v44, %v2053_v41  ;;  %v2167_v48 = vadd.f32 %v2166_v45, %v2165_v43 }
 0x219   :  { %v1232_v49 = vadd.f32 %v2055_v47, %v2858_v58  ;;  %v2926_v50 = vadd.f32 %v2164_v40, %v1229_v46 }
 0x21b   :  { %v2056_v51 = vpop.f32.mrb[100].mxu0  ;;  %v2168_v53 = vpop.f32.mrb[100].mxu1  ;;  %1484 = vadd.xlane.f32.xlu0 %v2926_v50  ;;  %v2929_v54 = vadd.f32 %v2167_v48, %v1232_v49 }
 0x21c   :  { %v2057_v55 = vpop.f32.mrb[101].mxu0  ;;  %v2169_v61 = vpop.f32.mrb[101].mxu1 }
 0x21d   :  { %v2058_v62 = vadd.f32 %v2057_v55, %v2056_v51  ;;  %v2170_v0 = vadd.f32 %v2169_v61, %v2168_v53  ;;  %v2059_v2 = vpop.f32.mrb[102].mxu0  ;;  %v2171_v3 = vpop.f32.mrb[102].mxu1  ;;  %1486 = vadd.xlane.f32.xlu1 %v2929_v54 }
 0x21e   :  { %v2060_v4 = vpop.f32.mrb[103].mxu0  ;;  %v2172_v5 = vpop.f32.mrb[103].mxu1 }
 0x21f   :  { %v1237_v6 = vadd.f32 %v2058_v62, %v2858_v58  ;;  %v2061_v7 = vadd.f32 %v2060_v4, %v2059_v2  ;;  %v2173_v9 = vadd.f32 %v2172_v5, %v2171_v3 }
 0x221   :  { %v1240_v10 = vadd.f32 %v2061_v7, %v2858_v58  ;;  %v2934_v12 = vadd.f32 %v2170_v0, %v1237_v6 }
 0x223   :  { %v2062_v13 = vpop.f32.mrb[104].mxu0  ;;  %v2174_v14 = vpop.f32.mrb[104].mxu1  ;;  %1488 = vadd.xlane.f32.xlu0 %v2934_v12  ;;  %v2937_v16 = vadd.f32 %v2173_v9, %v1240_v10 }
 0x224   :  { %v2063_v17 = vpop.f32.mrb[105].mxu0  ;;  %v2175_v19 = vpop.f32.mrb[105].mxu1 }
 0x225   :  { %v2064_v20 = vadd.f32 %v2063_v17, %v2062_v13  ;;  %v2176_v21 = vadd.f32 %v2175_v19, %v2174_v14  ;;  %v2065_v22 = vpop.f32.mrb[106].mxu0  ;;  %v2177_v56 = vpop.f32.mrb[106].mxu1  ;;  %1490 = vadd.xlane.f32.xlu1 %v2937_v16 }
 0x226   :  { %v2066_v57 = vpop.f32.mrb[107].mxu0  ;;  %v2178_v24 = vpop.f32.mrb[107].mxu1 }
 0x227   :  { %v1245_v25 = vadd.f32 %v2064_v20, %v2858_v58  ;;  %v2067_v26 = vadd.f32 %v2066_v57, %v2065_v22  ;;  %v2179_v27 = vadd.f32 %v2178_v24, %v2177_v56 }
 0x229   :  { %v1248_v28 = vadd.f32 %v2067_v26, %v2858_v58  ;;  %v2942_v29 = vadd.f32 %v2176_v21, %v1245_v25 }
 0x22b   :  { %v2068_v31 = vpop.f32.mrb[108].mxu0  ;;  %v2180_v32 = vpop.f32.mrb[108].mxu1  ;;  %1492 = vadd.xlane.f32.xlu0 %v2942_v29  ;;  %v2945_v34 = vadd.f32 %v2179_v27, %v1248_v28 }
 0x22c   :  { %v2069_v35 = vpop.f32.mrb[109].mxu0  ;;  %v2181_v37 = vpop.f32.mrb[109].mxu1 }
 0x22d   :  { %v2070_v40 = vadd.f32 %v2069_v35, %v2068_v31  ;;  %v2182_v41 = vadd.f32 %v2181_v37, %v2180_v32  ;;  %v2071_v43 = vpop.f32.mrb[110].mxu0  ;;  %v2183_v44 = vpop.f32.mrb[110].mxu1  ;;  %1494 = vadd.xlane.f32.xlu1 %v2945_v34 }
 0x22e   :  { %v2072_v45 = vpop.f32.mrb[111].mxu0  ;;  %v2184_v46 = vpop.f32.mrb[111].mxu1 }
 0x22f   :  { %v1253_v47 = vadd.f32 %v2070_v40, %v2858_v58  ;;  %v2073_v48 = vadd.f32 %v2072_v45, %v2071_v43  ;;  %v2185_v49 = vadd.f32 %v2184_v46, %v2183_v44 }
 0x231   :  { %v1256_v51 = vadd.f32 %v2073_v48, %v2858_v58  ;;  %v2950_v53 = vadd.f32 %v2182_v41, %v1253_v47 }
 0x233   :  { %v2074_v55 = vpop.f32.mrb[112].mxu0  ;;  %v2186_v61 = vpop.f32.mrb[112].mxu1  ;;  %1496 = vadd.xlane.f32.xlu0 %v2950_v53  ;;  %v2953_v62 = vadd.f32 %v2185_v49, %v1256_v51 }
 0x234   :  { %v2075_v0 = vpop.f32.mrb[113].mxu0  ;;  %v2187_v2 = vpop.f32.mrb[113].mxu1 }
 0x235   :  { %v2076_v3 = vadd.f32 %v2075_v0, %v2074_v55  ;;  %v2188_v4 = vadd.f32 %v2187_v2, %v2186_v61  ;;  %v2077_v5 = vpop.f32.mrb[114].mxu0  ;;  %v2189_v6 = vpop.f32.mrb[114].mxu1  ;;  %1498 = vadd.xlane.f32.xlu1 %v2953_v62 }
 0x236   :  { %v2078_v7 = vpop.f32.mrb[115].mxu0  ;;  %v2190_v9 = vpop.f32.mrb[115].mxu1 }
 0x237   :  { %v1261_v10 = vadd.f32 %v2076_v3, %v2858_v58  ;;  %v2079_v13 = vadd.f32 %v2078_v7, %v2077_v5  ;;  %v2191_v14 = vadd.f32 %v2190_v9, %v2189_v6 }
 0x239   :  { %v1264_v17 = vadd.f32 %v2079_v13, %v2858_v58  ;;  %v2958_v19 = vadd.f32 %v2188_v4, %v1261_v10 }
 0x23b   :  { %v2080_v20 = vpop.f32.mrb[116].mxu0  ;;  %v2192_v21 = vpop.f32.mrb[116].mxu1  ;;  %1500 = vadd.xlane.f32.xlu0 %v2958_v19  ;;  %v2961_v22 = vadd.f32 %v2191_v14, %v1264_v17 }
 0x23c   :  { %v2081_v56 = vpop.f32.mrb[117].mxu0  ;;  %v2193_v57 = vpop.f32.mrb[117].mxu1 }
 0x23d   :  { %v2082_v24 = vadd.f32 %v2081_v56, %v2080_v20  ;;  %v2194_v25 = vadd.f32 %v2193_v57, %v2192_v21  ;;  %v2083_v26 = vpop.f32.mrb[118].mxu0  ;;  %v2195_v27 = vpop.f32.mrb[118].mxu1  ;;  %1502 = vadd.xlane.f32.xlu1 %v2961_v22 }
 0x23e   :  { %v2084_v28 = vpop.f32.mrb[119].mxu0  ;;  %v2196_v31 = vpop.f32.mrb[119].mxu1 }
 0x23f   :  { %v1269_v32 = vadd.f32 %v2082_v24, %v2858_v58  ;;  %v2085_v35 = vadd.f32 %v2084_v28, %v2083_v26  ;;  %v2197_v37 = vadd.f32 %v2196_v31, %v2195_v27 }
 0x241   :  { %v1272_v40 = vadd.f32 %v2085_v35, %v2858_v58  ;;  %v2966_v41 = vadd.f32 %v2194_v25, %v1269_v32 }
 0x243   :  { %v2086_v43 = vpop.f32.mrb[120].mxu0  ;;  %v2198_v44 = vpop.f32.mrb[120].mxu1  ;;  %1504 = vadd.xlane.f32.xlu0 %v2966_v41  ;;  %v2969_v45 = vadd.f32 %v2197_v37, %v1272_v40 }
 0x244   :  { %v2087_v46 = vpop.f32.mrb[121].mxu0  ;;  %v2199_v47 = vpop.f32.mrb[121].mxu1 }
 0x245   :  { %v2088_v48 = vadd.f32 %v2087_v46, %v2086_v43  ;;  %v2200_v49 = vadd.f32 %v2199_v47, %v2198_v44  ;;  %v2089_v51 = vpop.f32.mrb[122].mxu0  ;;  %v2201_v55 = vpop.f32.mrb[122].mxu1  ;;  %1506 = vadd.xlane.f32.xlu1 %v2969_v45 }
 0x246   :  { %v2090_v61 = vpop.f32.mrb[123].mxu0  ;;  %v2202_v0 = vpop.f32.mrb[123].mxu1 }
 0x247   :  { %v1277_v2 = vadd.f32 %v2088_v48, %v2858_v58  ;;  %v2091_v3 = vadd.f32 %v2090_v61, %v2089_v51  ;;  %v2203_v4 = vadd.f32 %v2202_v0, %v2201_v55 }
 0x249   :  { %v1280_v5 = vadd.f32 %v2091_v3, %v2858_v58  ;;  %v2974_v6 = vadd.f32 %v2200_v49, %v1277_v2 }
 0x24b   :  { %v2092_v7 = vpop.f32.mrb[124].mxu0  ;;  %v2204_v9 = vpop.f32.mrb[124].mxu1  ;;  %1508 = vadd.xlane.f32.xlu0 %v2974_v6  ;;  %v2977_v10 = vadd.f32 %v2203_v4, %v1280_v5 }
 0x24c   :  { %v2093_v13 = vpop.f32.mrb[125].mxu0  ;;  %v2205_v14 = vpop.f32.mrb[125].mxu1 }
 0x24d   :  { %v2094_v17 = vadd.f32 %v2093_v13, %v2092_v7  ;;  %v2206_v20 = vadd.f32 %v2205_v14, %v2204_v9  ;;  %v2095_v21 = vpop.f32.mrb[126].mxu0  ;;  %v2207_v56 = vpop.f32.mrb[126].mxu1  ;;  %1510 = vadd.xlane.f32.xlu1 %v2977_v10 }
 0x24e   :  { %v2096_v57 = vpop.f32.mrb[127].mxu0  ;;  %v2208_v24 = vpop.f32.mrb[127].mxu1 }
 0x24f   :  { %v1285_v25 = vadd.f32 %v2094_v17, %v2858_v58  ;;  %v2097_v26 = vadd.f32 %v2096_v57, %v2095_v21  ;;  %v2209_v27 = vadd.f32 %v2208_v24, %v2207_v56 }
 0x251   :  { %v1288_v28 = vadd.f32 %v2097_v26, %v2858_v58  ;;  %v2982_v31 = vadd.f32 %v2206_v20, %v1285_v25 }
 0x253   :  { %1512 = vadd.xlane.f32.xlu0 %v2982_v31  ;;  %v2985_v32 = vadd.f32 %v2209_v27, %v1288_v28 }
 0x255   :  { %1514 = vadd.xlane.f32.xlu1 %v2985_v32 }
 0x268   :  { %v1453_v35 = vpop.xlane.xlu0 %1452 }
 0x269   :  { %v1517_v37 = vmul.f32 0.0078125, %v1453_v35 }
 0x26b   :  { %v2989_v40 = vsub.f32 %v2862_v36, %v1517_v37 }
 0x26c   :  { %v1455_v43 = vpop.xlane.xlu0 %1454 }
 0x26d   :  { %v1518_v44 = vmul.f32 0.0078125, %v1455_v43  ;;  %v1581_v46 = vmul.f32 %v2989_v40, %v2989_v40 }
 0x26f   :  { %v2994_v58 = vsub.f32 %v2865_v39, %v1518_v44  ;;  %1613 = vadd.xlane.f32.xlu0 %v1581_v46 }
 0x270   :  { %v1457_v47 = vpop.xlane.xlu1 %1456 }
 0x271   :  { %v1519_v48 = vmul.f32 0.0078125, %v1457_v47  ;;  %v1582_v49 = vmul.f32 %v2994_v58, %v2994_v58 }
 0x273   :  { %v2999_v51 = vsub.f32 %v2870_v52, %v1519_v48  ;;  %1615 = vadd.xlane.f32.xlu1 %v1582_v49 }
 0x274   :  { %v1459_v36 = vpop.xlane.xlu1 %1458 }
 0x275   :  { %v1520_v55 = vmul.f32 0.0078125, %v1459_v36  ;;  %v1583_v61 = vmul.f32 %v2999_v51, %v2999_v51 }
 0x277   :  { %v3004_v0 = vsub.f32 %v2873_v1, %v1520_v55  ;;  %1617 = vadd.xlane.f32.xlu0 %v1583_v61 }
 0x278   :  { %v1461_v39 = vpop.xlane.xlu0 %1460 }
 0x279   :  { %v1521_v2 = vmul.f32 0.0078125, %v1461_v39  ;;  %v1584_v3 = vmul.f32 %v3004_v0, %v3004_v0 }
 0x27a   :  { %v1463_v4 = vpop.xlane.xlu1 %1462 }
 0x27b   :  { %v3009_v5 = vsub.f32 %v2878_v8, %v1521_v2  ;;  %v1522_v52 = vmul.f32 0.0078125, %v1463_v4  ;;  %1619 = vadd.xlane.f32.xlu1 %v1584_v3 }
 0x27d   :  { %v3012_v7 = vsub.f32 %v2881_v11, %v1522_v52  ;;  %v1585_v9 = vmul.f32 %v3009_v5, %v3009_v5 }
 0x27f   :  { %1621 = vadd.xlane.f32.xlu0 %v1585_v9  ;;  %v1586_v1 = vmul.f32 %v3012_v7, %v3012_v7 }
 0x280   :  { %v1465_v13 = vpop.xlane.xlu0 %1464 }
 0x281   :  { %v1523_v14 = vmul.f32 0.0078125, %v1465_v13  ;;  %1623 = vadd.xlane.f32.xlu1 %v1586_v1 }
 0x282   :  { %v1467_v17 = vpop.xlane.xlu1 %1466 }
 0x283   :  { %v3019_v20 = vsub.f32 %v2886_v23, %v1523_v14  ;;  %v1524_v8 = vmul.f32 0.0078125, %v1467_v17 }
 0x285   :  { %v3022_v21 = vsub.f32 %v2889_v59, %v1524_v8  ;;  %v1587_v11 = vmul.f32 %v3019_v20, %v3019_v20 }
 0x287   :  { %1625 = vadd.xlane.f32.xlu0 %v1587_v11  ;;  %v1588_v56 = vmul.f32 %v3022_v21, %v3022_v21 }
 0x288   :  { %v1469_v57 = vpop.xlane.xlu0 %1468 }
 0x289   :  { %v1525_v24 = vmul.f32 0.0078125, %v1469_v57  ;;  %1627 = vadd.xlane.f32.xlu1 %v1588_v56 }
 0x28a   :  { %v1471_v25 = vpop.xlane.xlu1 %1470 }
 0x28b   :  { %v3029_v26 = vsub.f32 %v2894_v38, %v1525_v24  ;;  %v1526_v23 = vmul.f32 0.0078125, %v1471_v25 }
 0x28d   :  { %v3032_v27 = vsub.f32 %v2897_v42, %v1526_v23  ;;  %v1589_v59 = vmul.f32 %v3029_v26, %v3029_v26 }
 0x28f   :  { %1629 = vadd.xlane.f32.xlu0 %v1589_v59  ;;  %v1590_v28 = vmul.f32 %v3032_v27, %v3032_v27 }
 0x290   :  { %v1473_v35 = vpop.xlane.xlu0 %1472 }
 0x291   :  { %v1527_v37 = vmul.f32 0.0078125, %v1473_v35  ;;  %1631 = vadd.xlane.f32.xlu1 %v1590_v28 }
 0x292   :  { %v1475_v43 = vpop.xlane.xlu1 %1474 }
 0x293   :  { %v3039_v44 = vsub.f32 %v2902_v60, %v1527_v37  ;;  %v1528_v38 = vmul.f32 0.0078125, %v1475_v43 }
 0x295   :  { %v3042_v46 = vsub.f32 %v2905_v63, %v1528_v38  ;;  %v1591_v42 = vmul.f32 %v3039_v44, %v3039_v44 }
 0x297   :  { %1633 = vadd.xlane.f32.xlu0 %v1591_v42  ;;  %v1592_v47 = vmul.f32 %v3042_v46, %v3042_v46 }
 0x298   :  { %v1477_v48 = vpop.xlane.xlu0 %1476 }
 0x299   :  { %v1529_v49 = vmul.f32 0.0078125, %v1477_v48  ;;  %1635 = vadd.xlane.f32.xlu1 %v1592_v47 }
 0x29a   :  { %v1479_v36 = vpop.xlane.xlu1 %1478 }
 0x29b   :  { %v3049_v55 = vsub.f32 %v2910_v15, %v1529_v49  ;;  %v1530_v60 = vmul.f32 0.0078125, %v1479_v36 }
 0x29d   :  { %v3052_v61 = vsub.f32 %v2913_v18, %v1530_v60  ;;  %v1593_v63 = vmul.f32 %v3049_v55, %v3049_v55 }
 0x29f   :  { %1637 = vadd.xlane.f32.xlu0 %v1593_v63  ;;  %v1594_v39 = vmul.f32 %v3052_v61, %v3052_v61 }
 0x2a0   :  { %v1481_v2 = vpop.xlane.xlu0 %1480 }
 0x2a1   :  { %v1531_v3 = vmul.f32 0.0078125, %v1481_v2  ;;  %1639 = vadd.xlane.f32.xlu1 %v1594_v39 }
 0x2a2   :  { %v1483_v4 = vpop.xlane.xlu1 %1482 }
 0x2a3   :  { %v3059_v52 = vsub.f32 %v2918_v30, %v1531_v3  ;;  %v1532_v15 = vmul.f32 0.0078125, %v1483_v4 }
 0x2a5   :  { %v3062_v9 = vsub.f32 %v2921_v33, %v1532_v15  ;;  %v1595_v18 = vmul.f32 %v3059_v52, %v3059_v52 }
 0x2a7   :  { %1641 = vadd.xlane.f32.xlu0 %v1595_v18  ;;  %v1596_v1 = vmul.f32 %v3062_v9, %v3062_v9 }
 0x2a8   :  { %v1485_v13 = vpop.xlane.xlu0 %1484 }
 0x2a9   :  { %v1533_v14 = vmul.f32 0.0078125, %v1485_v13  ;;  %1643 = vadd.xlane.f32.xlu1 %v1596_v1 }
 0x2aa   :  { %v1487_v17 = vpop.xlane.xlu1 %1486 }
 0x2ab   :  { %v3069_v8 = vsub.f32 %v2926_v50, %v1533_v14  ;;  %v1534_v30 = vmul.f32 0.0078125, %v1487_v17 }
 0x2ad   :  { %v3072_v11 = vsub.f32 %v2929_v54, %v1534_v30  ;;  %v1597_v33 = vmul.f32 %v3069_v8, %v3069_v8 }
 0x2af   :  { %1645 = vadd.xlane.f32.xlu0 %v1597_v33  ;;  %v1598_v56 = vmul.f32 %v3072_v11, %v3072_v11 }
 0x2b0   :  { %v1489_v57 = vpop.xlane.xlu0 %1488 }
 0x2b1   :  { %v1535_v24 = vmul.f32 0.0078125, %v1489_v57  ;;  %1647 = vadd.xlane.f32.xlu1 %v1598_v56 }
 0x2b2   :  { %v1491_v25 = vpop.xlane.xlu1 %1490 }
 0x2b3   :  { %v3079_v23 = vsub.f32 %v2934_v12, %v1535_v24  ;;  %v1536_v50 = vmul.f32 0.0078125, %v1491_v25 }
 0x2b5   :  { %v3082_v59 = vsub.f32 %v2937_v16, %v1536_v50  ;;  %v1599_v54 = vmul.f32 %v3079_v23, %v3079_v23 }
 0x2b7   :  { %1649 = vadd.xlane.f32.xlu0 %v1599_v54  ;;  %v1600_v28 = vmul.f32 %v3082_v59, %v3082_v59 }
 0x2b8   :  { %v1493_v35 = vpop.xlane.xlu0 %1492 }
 0x2b9   :  { %v1537_v37 = vmul.f32 0.0078125, %v1493_v35  ;;  %1651 = vadd.xlane.f32.xlu1 %v1600_v28 }
 0x2ba   :  { %v1495_v43 = vpop.xlane.xlu1 %1494 }
 0x2bb   :  { %v3089_v38 = vsub.f32 %v2942_v29, %v1537_v37  ;;  %v1538_v12 = vmul.f32 0.0078125, %v1495_v43 }
 0x2bd   :  { %v3092_v42 = vsub.f32 %v2945_v34, %v1538_v12  ;;  %v1601_v16 = vmul.f32 %v3089_v38, %v3089_v38 }
 0x2bf   :  { %1653 = vadd.xlane.f32.xlu0 %v1601_v16  ;;  %v1602_v47 = vmul.f32 %v3092_v42, %v3092_v42 }
 0x2c0   :  { %v1497_v48 = vpop.xlane.xlu0 %1496 }
 0x2c1   :  { %v1539_v49 = vmul.f32 0.0078125, %v1497_v48  ;;  %1655 = vadd.xlane.f32.xlu1 %v1602_v47 }
 0x2c2   :  { %v1499_v36 = vpop.xlane.xlu1 %1498 }
 0x2c3   :  { %v3099_v60 = vsub.f32 %v2950_v53, %v1539_v49  ;;  %v1540_v29 = vmul.f32 0.0078125, %v1499_v36 }
 0x2c5   :  { %v3102_v63 = vsub.f32 %v2953_v62, %v1540_v29  ;;  %v1603_v34 = vmul.f32 %v3099_v60, %v3099_v60 }
 0x2c7   :  { %1657 = vadd.xlane.f32.xlu0 %v1603_v34  ;;  %v1604_v39 = vmul.f32 %v3102_v63, %v3102_v63 }
 0x2c8   :  { %v1501_v2 = vpop.xlane.xlu0 %1500 }
 0x2c9   :  { %v1541_v3 = vmul.f32 0.0078125, %v1501_v2  ;;  %1659 = vadd.xlane.f32.xlu1 %v1604_v39 }
 0x2ca   :  { %v1503_v4 = vpop.xlane.xlu1 %1502 }
 0x2cb   :  { %v3109_v15 = vsub.f32 %v2958_v19, %v1541_v3  ;;  %v1542_v53 = vmul.f32 0.0078125, %v1503_v4 }
 0x2cd   :  { %v3112_v18 = vsub.f32 %v2961_v22, %v1542_v53  ;;  %v1605_v62 = vmul.f32 %v3109_v15, %v3109_v15 }
 0x2cf   :  { %1661 = vadd.xlane.f32.xlu0 %v1605_v62  ;;  %v1606_v1 = vmul.f32 %v3112_v18, %v3112_v18  ;;  %v3151_v62 = vld [vmem:[%s3355_s5] ss:$0 sm:$0xff] }
 0x2d0   :  { %v1505_v13 = vpop.xlane.xlu0 %1504 }
 0x2d1   :  { %v1543_v14 = vmul.f32 0.0078125, %v1505_v13  ;;  %1663 = vadd.xlane.f32.xlu1 %v1606_v1 }
 0x2d2   :  { %v1507_v17 = vpop.xlane.xlu1 %1506 }
 0x2d3   :  { %v3119_v30 = vsub.f32 %v2966_v41, %v1543_v14  ;;  %v1544_v19 = vmul.f32 0.0078125, %v1507_v17  ;;  %v3157_v17 = vld [vmem:[%s3356_s6] ss:$0 sm:$0xff] }
 0x2d5   :  { %v3122_v33 = vsub.f32 %v2969_v45, %v1544_v19  ;;  %v1607_v22 = vmul.f32 %v3119_v30, %v3119_v30 }
 0x2d7   :  { %1665 = vadd.xlane.f32.xlu0 %v1607_v22  ;;  %v1608_v56 = vmul.f32 %v3122_v33, %v3122_v33 }
 0x2d8   :  { %v1509_v57 = vpop.xlane.xlu0 %1508 }
 0x2d9   :  { %v1545_v24 = vmul.f32 0.0078125, %v1509_v57  ;;  %1667 = vadd.xlane.f32.xlu1 %v1608_v56 }
 0x2da   :  { %v1511_v25 = vpop.xlane.xlu1 %1510 }
 0x2db   :  { %v3129_v50 = vsub.f32 %v2974_v6, %v1545_v24  ;;  %v1546_v41 = vmul.f32 0.0078125, %v1511_v25 }
 0x2dd   :  { %v3132_v54 = vsub.f32 %v2977_v10, %v1546_v41  ;;  %v1609_v45 = vmul.f32 %v3129_v50, %v3129_v50 }
 0x2df   :  { %1669 = vadd.xlane.f32.xlu0 %v1609_v45  ;;  %v1610_v28 = vmul.f32 %v3132_v54, %v3132_v54 }
 0x2e0   :  { %v1513_v35 = vpop.xlane.xlu0 %1512 }
 0x2e1   :  { %v1547_v37 = vmul.f32 0.0078125, %v1513_v35  ;;  %1671 = vadd.xlane.f32.xlu1 %v1610_v28 }
 0x2e2   :  { %v1515_v43 = vpop.xlane.xlu1 %1514 }
 0x2e3   :  { %v3139_v12 = vsub.f32 %v2982_v31, %v1547_v37  ;;  %v1548_v6 = vmul.f32 0.0078125, %v1515_v43 }
 0x2e5   :  { %v3142_v16 = vsub.f32 %v2985_v32, %v1548_v6  ;;  %v1611_v10 = vmul.f32 %v3139_v12, %v3139_v12 }
 0x2e7   :  { %1673 = vadd.xlane.f32.xlu0 %v1611_v10  ;;  %v1612_v47 = vmul.f32 %v3142_v16, %v3142_v16 }
 0x2e9   :  { %1675 = vadd.xlane.f32.xlu1 %v1612_v47 }
 0x2fc   :  { %v1614_v48 = vpop.xlane.xlu0 %1613 }
 0x2fd   :  { %v1677_v49 = vmul.f32 0.0078125, %v1614_v48 }
 0x2ff   :  { %v1709_v36 = vadd.f32 1e-05, %v1677_v49 }
 0x300   :  { %v1616_v29 = vpop.xlane.xlu1 %1615 }
 0x301   :  { %2291 = vrsqrt.f32 %v1709_v36  ;;  %v1678_v34 = vmul.f32 0.0078125, %v1616_v29 }
 0x303   :  { %v1710_v31 = vadd.f32 1e-05, %v1678_v34 }
 0x304   :  { %v1618_v39 = vpop.xlane.xlu0 %1617 }
 0x305   :  { %2293 = vrsqrt.f32 %v1710_v31  ;;  %v1679_v2 = vmul.f32 0.0078125, %v1618_v39 }
 0x307   :  { %v1711_v32 = vadd.f32 1e-05, %v1679_v2 }
 0x308   :  { %v1620_v3 = vpop.xlane.xlu1 %1619 }
 0x309   :  { %2295 = vrsqrt.f32 %v1711_v32  ;;  %v1680_v4 = vmul.f32 0.0078125, %v1620_v3 }
 0x30b   :  { %v2292_v53 = vpop.eup %2291  ;;  %v1712_v1 = vadd.f32 1e-05, %v1680_v4 }
 0x30c   :  { %v1773_v13 = vmul.f32 %v2292_v53, %v2989_v40  ;;  %v1622_v14 = vpop.xlane.xlu0 %1621 }
 0x30d   :  { %2297 = vrsqrt.f32 %v1712_v1  ;;  %v1681_v19 = vmul.f32 0.0078125, %v1622_v14 }
 0x30e   :  { %v1812_v22 = vmul.f32 %v3151_v62, %v1773_v13  ;;  %v1624_v56 = vpop.xlane.xlu1 %1623 }
 0x30f   :  { %v2294_v57 = vpop.eup %2293  ;;  %v1713_v24 = vadd.f32 1e-05, %v1681_v19  ;;  %v1682_v25 = vmul.f32 0.0078125, %v1624_v56 }
 0x310   :  { %v1851_v41 = vadd.f32 %v3157_v17, %v1812_v22  ;;  %v1774_v45 = vmul.f32 %v2294_v57, %v2994_v58 }
 0x311   :  { %2299 = vrsqrt.f32 %v1713_v24  ;;  %v1714_v40 = vadd.f32 1e-05, %v1682_v25 }
 0x312   :  { %1883 = vst [vmem:[%s3357_s7] sm:$0xff] %v1851_v41  ;;  %v1813_v28 = vmul.f32 %v3151_v62, %v1774_v45 }
 0x313   :  { %v2296_v35 = vpop.eup %2295  ;;  %2301 = vrsqrt.f32 %v1714_v40 }
 0x314   :  { %v1852_v37 = vadd.f32 %v3157_v17, %v1813_v28  ;;  %v1775_v43 = vmul.f32 %v2296_v35, %v2999_v51  ;;  %v1626_v6 = vpop.xlane.xlu0 %1625 }
 0x315   :  { %v1683_v10 = vmul.f32 0.0078125, %v1626_v6 }
 0x316   :  { %1884 = vst [vmem:[%s3357_s7 + $0x8] sm:$0xff] %v1852_v37  ;;  %v1814_v58 = vmul.f32 %v3151_v62, %v1775_v43  ;;  %v1628_v47 = vpop.xlane.xlu1 %1627 }
 0x317   :  { %v2298_v48 = vpop.eup %2297  ;;  %v1715_v49 = vadd.f32 1e-05, %v1683_v10  ;;  %v1684_v36 = vmul.f32 0.0078125, %v1628_v47 }
 0x318   :  { %v1853_v29 = vadd.f32 %v3157_v17, %v1814_v58  ;;  %v1776_v34 = vmul.f32 %v2298_v48, %v3004_v0 }
 0x319   :  { %2303 = vrsqrt.f32 %v1715_v49  ;;  %v1716_v31 = vadd.f32 1e-05, %v1684_v36 }
 0x31a   :  { %1885 = vst [vmem:[%s3357_s7 + $0x10] sm:$0xff] %v1853_v29  ;;  %v1815_v51 = vmul.f32 %v3151_v62, %v1776_v34 }
 0x31b   :  { %v2300_v39 = vpop.eup %2299  ;;  %2305 = vrsqrt.f32 %v1716_v31 }
 0x31c   :  { %v1854_v2 = vadd.f32 %v3157_v17, %v1815_v51  ;;  %v1777_v32 = vmul.f32 %v2300_v39, %v3009_v5  ;;  %v1630_v3 = vpop.xlane.xlu0 %1629 }
 0x31d   :  { %v2302_v4 = vpop.eup %2301  ;;  %v1685_v53 = vmul.f32 0.0078125, %v1630_v3 }
 0x31e   :  { %1886 = vst [vmem:[%s3357_s7 + $0x18] sm:$0xff] %v1854_v2  ;;  %v1816_v0 = vmul.f32 %v3151_v62, %v1777_v32  ;;  %v1778_v1 = vmul.f32 %v2302_v4, %v3012_v7  ;;  %v1632_v13 = vpop.xlane.xlu1 %1631 }
 0x31f   :  { %v1717_v14 = vadd.f32 1e-05, %v1685_v53  ;;  %v1686_v19 = vmul.f32 0.0078125, %v1632_v13 }
 0x320   :  { %v1855_v22 = vadd.f32 %v3157_v17, %v1816_v0  ;;  %v1817_v56 = vmul.f32 %v3151_v62, %v1778_v1 }
 0x321   :  { %2307 = vrsqrt.f32 %v1717_v14  ;;  %v1718_v5 = vadd.f32 1e-05, %v1686_v19 }
 0x322   :  { %1887 = vst [vmem:[%s3357_s7 + $0x20] sm:$0xff] %v1855_v22  ;;  %v1856_v57 = vadd.f32 %v3157_v17, %v1817_v56 }
 0x323   :  { %v2304_v24 = vpop.eup %2303  ;;  %2309 = vrsqrt.f32 %v1718_v5 }
 0x324   :  { %1888 = vst [vmem:[%s3357_s7 + $0x28] sm:$0xff] %v1856_v57  ;;  %v1779_v7 = vmul.f32 %v2304_v24, %v3019_v20  ;;  %v1634_v25 = vpop.xlane.xlu0 %1633 }
 0x325   :  { %v2306_v41 = vpop.eup %2305  ;;  %v1687_v45 = vmul.f32 0.0078125, %v1634_v25 }
 0x326   :  { %v1818_v40 = vmul.f32 %v3151_v62, %v1779_v7  ;;  %v1780_v28 = vmul.f32 %v2306_v41, %v3022_v21  ;;  %v1636_v35 = vpop.xlane.xlu1 %1635 }
 0x327   :  { %v1719_v37 = vadd.f32 1e-05, %v1687_v45  ;;  %v1688_v43 = vmul.f32 0.0078125, %v1636_v35 }
 0x328   :  { %v1857_v6 = vadd.f32 %v3157_v17, %v1818_v40  ;;  %v1819_v10 = vmul.f32 %v3151_v62, %v1780_v28 }
 0x329   :  { %2311 = vrsqrt.f32 %v1719_v37  ;;  %v1720_v58 = vadd.f32 1e-05, %v1688_v43 }
 0x32a   :  { %1889 = vst [vmem:[%s3357_s7 + $0x30] sm:$0xff] %v1857_v6  ;;  %v1858_v20 = vadd.f32 %v3157_v17, %v1819_v10 }
 0x32b   :  { %v2308_v47 = vpop.eup %2307  ;;  %2313 = vrsqrt.f32 %v1720_v58 }
 0x32c   :  { %1890 = vst [vmem:[%s3357_s7 + $0x38] sm:$0xff] %v1858_v20  ;;  %v1781_v21 = vmul.f32 %v2308_v47, %v3029_v26  ;;  %v1638_v48 = vpop.xlane.xlu0 %1637 }
 0x32d   :  { %v2310_v49 = vpop.eup %2309  ;;  %v1689_v36 = vmul.f32 0.0078125, %v1638_v48 }
 0x32e   :  { %v1820_v29 = vmul.f32 %v3151_v62, %v1781_v21  ;;  %v1782_v34 = vmul.f32 %v2310_v49, %v3032_v27  ;;  %v1640_v31 = vpop.xlane.xlu1 %1639 }
 0x32f   :  { %v1721_v51 = vadd.f32 1e-05, %v1689_v36  ;;  %v1690_v39 = vmul.f32 0.0078125, %v1640_v31 }
 0x330   :  { %v1859_v2 = vadd.f32 %v3157_v17, %v1820_v29  ;;  %v1821_v32 = vmul.f32 %v3151_v62, %v1782_v34 }
 0x331   :  { %2315 = vrsqrt.f32 %v1721_v51  ;;  %v1722_v3 = vadd.f32 1e-05, %v1690_v39 }
 0x332   :  { %1891 = vst [vmem:[%s3357_s7 + $0x40] sm:$0xff] %v1859_v2  ;;  %v1860_v26 = vadd.f32 %v3157_v17, %v1821_v32 }
 0x333   :  { %v2312_v4 = vpop.eup %2311  ;;  %2317 = vrsqrt.f32 %v1722_v3 }
 0x334   :  { %1892 = vst [vmem:[%s3357_s7 + $0x48] sm:$0xff] %v1860_v26  ;;  %v1783_v27 = vmul.f32 %v2312_v4, %v3039_v44  ;;  %v1642_v53 = vpop.xlane.xlu0 %1641 }
 0x335   :  { %v2314_v0 = vpop.eup %2313  ;;  %v1691_v1 = vmul.f32 0.0078125, %v1642_v53 }
 0x336   :  { %v1822_v13 = vmul.f32 %v3151_v62, %v1783_v27  ;;  %v1784_v14 = vmul.f32 %v2314_v0, %v3042_v46  ;;  %v1644_v19 = vpop.xlane.xlu1 %1643 }
 0x337   :  { %v1723_v22 = vadd.f32 1e-05, %v1691_v1  ;;  %v1692_v56 = vmul.f32 0.0078125, %v1644_v19 }
 0x338   :  { %v1861_v5 = vadd.f32 %v3157_v17, %v1822_v13  ;;  %v1823_v57 = vmul.f32 %v3151_v62, %v1784_v14 }
 0x339   :  { %2319 = vrsqrt.f32 %v1723_v22  ;;  %v1724_v24 = vadd.f32 1e-05, %v1692_v56 }
 0x33a   :  { %1893 = vst [vmem:[%s3357_s7 + $0x50] sm:$0xff] %v1861_v5  ;;  %v1862_v44 = vadd.f32 %v3157_v17, %v1823_v57 }
 0x33b   :  { %v2316_v7 = vpop.eup %2315  ;;  %2321 = vrsqrt.f32 %v1724_v24 }
 0x33c   :  { %1894 = vst [vmem:[%s3357_s7 + $0x58] sm:$0xff] %v1862_v44  ;;  %v1785_v46 = vmul.f32 %v2316_v7, %v3049_v55  ;;  %v1646_v25 = vpop.xlane.xlu0 %1645 }
 0x33d   :  { %v2318_v41 = vpop.eup %2317  ;;  %v1693_v45 = vmul.f32 0.0078125, %v1646_v25 }
 0x33e   :  { %v1824_v40 = vmul.f32 %v3151_v62, %v1785_v46  ;;  %v1786_v28 = vmul.f32 %v2318_v41, %v3052_v61  ;;  %v1648_v35 = vpop.xlane.xlu1 %1647 }
 0x33f   :  { %v1725_v37 = vadd.f32 1e-05, %v1693_v45  ;;  %v1694_v43 = vmul.f32 0.0078125, %v1648_v35 }
 0x340   :  { %v1863_v6 = vadd.f32 %v3157_v17, %v1824_v40  ;;  %v1825_v10 = vmul.f32 %v3151_v62, %v1786_v28 }
 0x341   :  { %2323 = vrsqrt.f32 %v1725_v37  ;;  %v1726_v58 = vadd.f32 1e-05, %v1694_v43 }
 0x342   :  { %1895 = vst [vmem:[%s3357_s7 + $0x60] sm:$0xff] %v1863_v6  ;;  %v1864_v55 = vadd.f32 %v3157_v17, %v1825_v10 }
 0x343   :  { %v2320_v20 = vpop.eup %2319  ;;  %2325 = vrsqrt.f32 %v1726_v58 }
 0x344   :  { %1896 = vst [vmem:[%s3357_s7 + $0x68] sm:$0xff] %v1864_v55  ;;  %v1787_v61 = vmul.f32 %v2320_v20, %v3059_v52  ;;  %v1650_v47 = vpop.xlane.xlu0 %1649 }
 0x345   :  { %v2322_v21 = vpop.eup %2321  ;;  %v1695_v48 = vmul.f32 0.0078125, %v1650_v47 }
 0x346   :  { %v1826_v49 = vmul.f32 %v3151_v62, %v1787_v61  ;;  %v1788_v36 = vmul.f32 %v2322_v21, %v3062_v9  ;;  %v1652_v29 = vpop.xlane.xlu1 %1651 }
 0x347   :  { %v1727_v34 = vadd.f32 1e-05, %v1695_v48  ;;  %v1696_v31 = vmul.f32 0.0078125, %v1652_v29 }
 0x348   :  { %v1865_v51 = vadd.f32 %v3157_v17, %v1826_v49  ;;  %v1827_v39 = vmul.f32 %v3151_v62, %v1788_v36 }
 0x349   :  { %2327 = vrsqrt.f32 %v1727_v34  ;;  %v1728_v2 = vadd.f32 1e-05, %v1696_v31 }
 0x34a   :  { %1897 = vst [vmem:[%s3357_s7 + $0x70] sm:$0xff] %v1865_v51  ;;  %v1866_v52 = vadd.f32 %v3157_v17, %v1827_v39 }
 0x34b   :  { %v2324_v32 = vpop.eup %2323  ;;  %2329 = vrsqrt.f32 %v1728_v2 }
 0x34c   :  { %1898 = vst [vmem:[%s3357_s7 + $0x78] sm:$0xff] %v1866_v52  ;;  %v1789_v9 = vmul.f32 %v2324_v32, %v3069_v8  ;;  %v1654_v3 = vpop.xlane.xlu0 %1653 }
 0x34d   :  { %v2326_v26 = vpop.eup %2325  ;;  %v1697_v4 = vmul.f32 0.0078125, %v1654_v3 }
 0x34e   :  { %v1828_v27 = vmul.f32 %v3151_v62, %v1789_v9  ;;  %v1790_v53 = vmul.f32 %v2326_v26, %v3072_v11  ;;  %v1656_v0 = vpop.xlane.xlu1 %1655 }
 0x34f   :  { %v1729_v1 = vadd.f32 1e-05, %v1697_v4  ;;  %v1698_v13 = vmul.f32 0.0078125, %v1656_v0 }
 0x350   :  { %v1867_v14 = vadd.f32 %v3157_v17, %v1828_v27  ;;  %v1829_v19 = vmul.f32 %v3151_v62, %v1790_v53 }
 0x351   :  { %2331 = vrsqrt.f32 %v1729_v1  ;;  %v1730_v22 = vadd.f32 1e-05, %v1698_v13 }
 0x352   :  { %1899 = vst [vmem:[%s3357_s7 + $0x80] sm:$0xff] %v1867_v14  ;;  %v1868_v8 = vadd.f32 %v3157_v17, %v1829_v19 }
 0x353   :  { %v2328_v56 = vpop.eup %2327  ;;  %2333 = vrsqrt.f32 %v1730_v22 }
 0x354   :  { %1900 = vst [vmem:[%s3357_s7 + $0x88] sm:$0xff] %v1868_v8  ;;  %v1791_v11 = vmul.f32 %v2328_v56, %v3079_v23  ;;  %v1658_v5 = vpop.xlane.xlu0 %1657 }
 0x355   :  { %v2330_v57 = vpop.eup %2329  ;;  %v1699_v24 = vmul.f32 0.0078125, %v1658_v5 }
 0x356   :  { %v1830_v44 = vmul.f32 %v3151_v62, %v1791_v11  ;;  %v1792_v7 = vmul.f32 %v2330_v57, %v3082_v59  ;;  %v1660_v46 = vpop.xlane.xlu1 %1659 }
 0x357   :  { %v1731_v25 = vadd.f32 1e-05, %v1699_v24  ;;  %v1700_v41 = vmul.f32 0.0078125, %v1660_v46 }
 0x358   :  { %v1869_v45 = vadd.f32 %v3157_v17, %v1830_v44  ;;  %v1831_v40 = vmul.f32 %v3151_v62, %v1792_v7 }
 0x359   :  { %2335 = vrsqrt.f32 %v1731_v25  ;;  %v1732_v28 = vadd.f32 1e-05, %v1700_v41 }
 0x35a   :  { %1901 = vst [vmem:[%s3357_s7 + $0x90] sm:$0xff] %v1869_v45  ;;  %v1870_v23 = vadd.f32 %v3157_v17, %v1831_v40 }
 0x35b   :  { %v2332_v35 = vpop.eup %2331  ;;  %2337 = vrsqrt.f32 %v1732_v28 }
 0x35c   :  { %1902 = vst [vmem:[%s3357_s7 + $0x98] sm:$0xff] %v1870_v23  ;;  %v1793_v59 = vmul.f32 %v2332_v35, %v3089_v38  ;;  %v1662_v37 = vpop.xlane.xlu0 %1661 }
 0x35d   :  { %v2334_v43 = vpop.eup %2333  ;;  %v1701_v6 = vmul.f32 0.0078125, %v1662_v37 }
 0x35e   :  { %v1832_v10 = vmul.f32 %v3151_v62, %v1793_v59  ;;  %v1794_v58 = vmul.f32 %v2334_v43, %v3092_v42  ;;  %v1664_v55 = vpop.xlane.xlu1 %1663 }
 0x35f   :  { %v1733_v20 = vadd.f32 1e-05, %v1701_v6  ;;  %v1702_v61 = vmul.f32 0.0078125, %v1664_v55 }
 0x360   :  { %v1871_v47 = vadd.f32 %v3157_v17, %v1832_v10  ;;  %v1833_v21 = vmul.f32 %v3151_v62, %v1794_v58 }
 0x361   :  { %2339 = vrsqrt.f32 %v1733_v20  ;;  %v1734_v48 = vadd.f32 1e-05, %v1702_v61 }
 0x362   :  { %1903 = vst [vmem:[%s3357_s7 + $0xa0] sm:$0xff] %v1871_v47  ;;  %v1872_v38 = vadd.f32 %v3157_v17, %v1833_v21 }
 0x363   :  { %v2336_v49 = vpop.eup %2335  ;;  %2341 = vrsqrt.f32 %v1734_v48 }
 0x364   :  { %1904 = vst [vmem:[%s3357_s7 + $0xa8] sm:$0xff] %v1872_v38  ;;  %v1795_v42 = vmul.f32 %v2336_v49, %v3099_v60  ;;  %v1666_v36 = vpop.xlane.xlu0 %1665 }
 0x365   :  { %v2338_v29 = vpop.eup %2337  ;;  %v1703_v34 = vmul.f32 0.0078125, %v1666_v36 }
 0x366   :  { %v1834_v31 = vmul.f32 %v3151_v62, %v1795_v42  ;;  %v1796_v51 = vmul.f32 %v2338_v29, %v3102_v63  ;;  %v1668_v39 = vpop.xlane.xlu1 %1667 }
 0x367   :  { %v1735_v2 = vadd.f32 1e-05, %v1703_v34  ;;  %v1704_v52 = vmul.f32 0.0078125, %v1668_v39 }
 0x368   :  { %v1873_v32 = vadd.f32 %v3157_v17, %v1834_v31  ;;  %v1835_v9 = vmul.f32 %v3151_v62, %v1796_v51 }
 0x369   :  { %2343 = vrsqrt.f32 %v1735_v2  ;;  %v1736_v3 = vadd.f32 1e-05, %v1704_v52 }
 0x36a   :  { %1905 = vst [vmem:[%s3357_s7 + $0xb0] sm:$0xff] %v1873_v32  ;;  %v1874_v60 = vadd.f32 %v3157_v17, %v1835_v9 }
 0x36b   :  { %v2340_v26 = vpop.eup %2339  ;;  %2345 = vrsqrt.f32 %v1736_v3 }
 0x36c   :  { %1906 = vst [vmem:[%s3357_s7 + $0xb8] sm:$0xff] %v1874_v60  ;;  %v1797_v63 = vmul.f32 %v2340_v26, %v3109_v15  ;;  %v1670_v4 = vpop.xlane.xlu0 %1669 }
 0x36d   :  { %v2342_v27 = vpop.eup %2341  ;;  %v1705_v53 = vmul.f32 0.0078125, %v1670_v4 }
 0x36e   :  { %v1836_v0 = vmul.f32 %v3151_v62, %v1797_v63  ;;  %v1798_v1 = vmul.f32 %v2342_v27, %v3112_v18  ;;  %v1672_v13 = vpop.xlane.xlu1 %1671 }
 0x36f   :  { %v1737_v14 = vadd.f32 1e-05, %v1705_v53  ;;  %v1706_v19 = vmul.f32 0.0078125, %v1672_v13 }
 0x370   :  { %v1875_v22 = vadd.f32 %v3157_v17, %v1836_v0  ;;  %v1837_v8 = vmul.f32 %v3151_v62, %v1798_v1 }
 0x371   :  { %2347 = vrsqrt.f32 %v1737_v14  ;;  %v1738_v56 = vadd.f32 1e-05, %v1706_v19 }
 0x372   :  { %1907 = vst [vmem:[%s3357_s7 + $0xc0] sm:$0xff] %v1875_v22  ;;  %v1876_v15 = vadd.f32 %v3157_v17, %v1837_v8 }
 0x373   :  { %v2344_v11 = vpop.eup %2343  ;;  %2349 = vrsqrt.f32 %v1738_v56 }
 0x374   :  { %1908 = vst [vmem:[%s3357_s7 + $0xc8] sm:$0xff] %v1876_v15  ;;  %v1799_v18 = vmul.f32 %v2344_v11, %v3119_v30  ;;  %v1674_v5 = vpop.xlane.xlu0 %1673 }
 0x375   :  { %v2346_v57 = vpop.eup %2345  ;;  %v1707_v24 = vmul.f32 0.0078125, %v1674_v5 }
 0x376   :  { %v1838_v44 = vmul.f32 %v3151_v62, %v1799_v18  ;;  %v1800_v7 = vmul.f32 %v2346_v57, %v3122_v33  ;;  %v1676_v46 = vpop.xlane.xlu1 %1675 }
 0x377   :  { %v1739_v25 = vadd.f32 1e-05, %v1707_v24  ;;  %v1708_v41 = vmul.f32 0.0078125, %v1676_v46 }
 0x378   :  { %v1877_v45 = vadd.f32 %v3157_v17, %v1838_v44  ;;  %v1839_v40 = vmul.f32 %v3151_v62, %v1800_v7 }
 0x379   :  { %2351 = vrsqrt.f32 %v1739_v25  ;;  %v1740_v28 = vadd.f32 1e-05, %v1708_v41 }
 0x37a   :  { %1909 = vst [vmem:[%s3357_s7 + $0xd0] sm:$0xff] %v1877_v45  ;;  %v1878_v30 = vadd.f32 %v3157_v17, %v1839_v40 }
 0x37b   :  { %v2348_v23 = vpop.eup %2347  ;;  %2353 = vrsqrt.f32 %v1740_v28 }
 0x37c   :  { %1910 = vst [vmem:[%s3357_s7 + $0xd8] sm:$0xff] %v1878_v30  ;;  %v1801_v33 = vmul.f32 %v2348_v23, %v3129_v50 }
 0x37d   :  { %v2350_v35 = vpop.eup %2349 }
 0x37e   :  { %v1840_v59 = vmul.f32 %v3151_v62, %v1801_v33  ;;  %v1802_v37 = vmul.f32 %v2350_v35, %v3132_v54 }
 0x380   :  { %v1879_v43 = vadd.f32 %v3157_v17, %v1840_v59  ;;  %v1841_v6 = vmul.f32 %v3151_v62, %v1802_v37 }
 0x382   :  { %1911 = vst [vmem:[%s3357_s7 + $0xe0] sm:$0xff] %v1879_v43  ;;  %v1880_v10 = vadd.f32 %v3157_v17, %v1841_v6 }
 0x383   :  { %v2352_v58 = vpop.eup %2351 }
 0x384   :  { %1912 = vst [vmem:[%s3357_s7 + $0xe8] sm:$0xff] %v1880_v10  ;;  %v1803_v50 = vmul.f32 %v2352_v58, %v3139_v12 }
 0x385   :  { %v2354_v55 = vpop.eup %2353 }
 0x386   :  { %v1842_v54 = vmul.f32 %v3151_v62, %v1803_v50  ;;  %v1804_v20 = vmul.f32 %v2354_v55, %v3142_v16 }
 0x388   :  { %v1881_v61 = vadd.f32 %v3157_v17, %v1842_v54  ;;  %v1843_v47 = vmul.f32 %v3151_v62, %v1804_v20 }
 0x38a   :  { %1913 = vst [vmem:[%s3357_s7 + $0xf0] sm:$0xff] %v1881_v61  ;;  %v1882_v21 = vadd.f32 %v3157_v17, %v1843_v47 }
 0x38c   :  { %1914 = vst [vmem:[%s3357_s7 + $0xf8] sm:$0xff] %v1882_v21 }

</bundles_post_ra>
